<compile_context>
chip_gen: v6e
topology: v6e:2x2x1
jax: 0.10.0
libtpu: 0.0.40
codegen_flags: <defaults>
</compile_context>

<pallas_src>
import functools

import jax
import jax.numpy as jnp
import numpy as np
from jax.experimental import pallas as pl
from jax.experimental.pallas import tpu as pltpu

HIGHEST = jax.lax.Precision.HIGHEST


# ----------------------------- Pallas kernel ------------------------------ #
def rlfq_kernel(z_ref, win_ref, bin_ref, wext_ref, bext_ref,
                zq_ref, idx_ref, *, n_q, D, cd, scales):
  """One (batch, time-tile) block through all n_q LFQ quantizers.

  z_ref   : (D, Tt)          residual, channels on sublanes, time on lanes
  win_ref : (n_q, cd, D)     in_proj weights  (h = W_in @ res)
  bin_ref : (n_q, cd, 1)     in_proj biases
  wext_ref: (n_q, D+1, cd)   out_proj weights with a trailing `powers` row
  bext_ref: (n_q, D+1, 1)    out_proj biases   (last row is 0)
  zq_ref  : (D, Tt)          quantized output (= z - final residual)
  idx_ref : (n_q, Tt)        codebook indices (int32), lane-dense
  """
  res = z_ref[...]                                   # (D, Tt) f32
  half = (2.0 ** cd - 1.0) * 0.5                     # (2**cd - 1) / 2, exact

  for i in range(n_q):                               # n_q small & static
    scale = scales[i]                                # 2**-i, python float

    # in_proj (1x1 weight-normed conv == matmul over the channel dim)
    h = jnp.dot(win_ref[i], res, precision=HIGHEST,
                preferred_element_type=jnp.float32) + bin_ref[i]     # (cd, Tt)
    q = jnp.where(h > 0, scale, -scale).astype(jnp.float32)          # (cd, Tt)

    # fused out_proj + code index: rows 0..D-1 are y, row D is p = powers @ q.
    yp = jnp.dot(wext_ref[i], q, precision=HIGHEST,
                 preferred_element_type=jnp.float32) + bext_ref[i]   # (D+1, Tt)
    res = res - yp[:D, :]                                            # (D, Tt)

    # p = scale * (2*idx - (2**cd - 1))  ->  idx = p/(2*scale) + (2**cd-1)/2
    # (operands are powers of two; exact in f32 for cd <= 23)
    idx_f = yp[D:D + 1, :] * (0.5 / scale) + half                    # (1, Tt)
    idx_ref[pl.ds(i, 1), :] = idx_f.astype(jnp.int32)

  # z_q = sum_i y_i == z - final residual by construction.
  zq_ref[...] = z_ref[...] - res


# ------------------------------- wrapper ----------------------------------- #
def _round_up(x, m):
  return ((x + m - 1) // m) * m


def _cdiv(a, b):
  return (a + b - 1) // b


def _choose_tiling(B, T, *, target=8192, min_steps=2):
  """Pick a lane-aligned time tile and the padded time length.

  The tile is a multiple of 128 (lane-dense stores), at most `target`, and is
  shrunk so the grid keeps >= `min_steps` steps (v7x dual-TensorCore sharding).
  """
  T128 = _round_up(max(T, 128), 128)
  t_tile = min(target, T128)
  while t_tile > 128 and B * _cdiv(T128, t_tile) < min_steps:
    t_tile = _round_up(t_tile // 2, 128)
  T_pad = _round_up(T128, t_tile)
  return t_tile, T_pad


def residual_lfq_forward(z, params, *, t_tile=None):
  """z: (B, D, T) float32 (PyTorch NCT layout). Returns (z_q, codes, loss)."""
  win, b_in, wext, b_ext, scales = params
  n_q, cd, D = win.shape
  B, Dz, T = z.shape
  assert Dz == D

  if t_tile is None:
    t_tile, T_pad = _choose_tiling(B, T)
  else:
    assert t_tile % 128 == 0, "time tile must be lane-aligned (multiple of 128)"
    T_pad = _round_up(max(T, t_tile), t_tile)

  # Pad the time axis so every block is full-width (unmasked lane-dense
  # stores); padded columns are independent and sliced off afterwards.
  z_in = z if T_pad == T else jnp.pad(z, ((0, 0), (0, 0), (0, T_pad - T)))
  n_t = T_pad // t_tile

  kernel = functools.partial(rlfq_kernel, n_q=n_q, D=D, cd=cd, scales=scales)

  z_q, codes = pl.pallas_call(
      kernel,
      out_shape=(jax.ShapeDtypeStruct((B, D, T_pad), jnp.float32),
                 jax.ShapeDtypeStruct((B, n_q, T_pad), jnp.int32)),
      grid_spec=pltpu.PrefetchScalarGridSpec(
          num_scalar_prefetch=0,
          grid=(B, n_t),
          in_specs=[
              pl.BlockSpec((None, D, t_tile), lambda b, t: (b, 0, t)),   # z
              pl.BlockSpec((n_q, cd, D), lambda b, t: (0, 0, 0)),        # W_in
              pl.BlockSpec((n_q, cd, 1), lambda b, t: (0, 0, 0)),        # b_in
              pl.BlockSpec((n_q, D + 1, cd), lambda b, t: (0, 0, 0)),    # W_out+
              pl.BlockSpec((n_q, D + 1, 1), lambda b, t: (0, 0, 0)),     # b_out+
          ],
          out_specs=[
              pl.BlockSpec((None, D, t_tile), lambda b, t: (b, 0, t)),
              pl.BlockSpec((None, n_q, t_tile), lambda b, t: (b, 0, t)),
          ],
      ),
      compiler_params=pltpu.CompilerParams(
          dimension_semantics=("parallel", "parallel")),
  )(z_in, win, b_in, wext, b_ext)

  if T_pad != T:
    z_q = z_q[:, :, :T]
    codes = codes[:, :, :T]

  # eval mode: every per-quantizer aux loss is exactly zero.
  loss = jnp.float32(0.0)
  return z_q, codes, loss


# ----------------------- deterministic parameter init ---------------------- #
def _weight_norm(v, g):
  # PyTorch weight_norm(dim=0): w = g * v / ||v|| with the norm over the
  # remaining dims per output channel (kernel_size == 1 so v is 2-D here).
  norm = jnp.sqrt(jnp.sum(v * v, axis=1, keepdims=True))
  return g[:, None] * v / norm


def init_params(key, n_q, D, cd):
  # exactness of the fused f32 code-index matmul requires cd + 1 <= 24 bits
  assert cd <= 23, "codebook_dim too large for exact f32 index recovery"
  powers_row = jnp.array([[2.0 ** (cd - 1 - k) for k in range(cd)]],
                         dtype=jnp.float32)                         # (1, cd)

  win, b_in, wext, b_ext = [], [], [], []
  for _ in range(n_q):
    key, k1, k2, k3, k4, k5, k6 = jax.random.split(key, 7)
    v_in = jax.random.normal(k1, (cd, D), jnp.float32) * 0.3
    g_in = 0.5 + jax.random.uniform(k2, (cd,), jnp.float32)
    W_in = _weight_norm(v_in, g_in)                                 # (cd, D)
    bi = jax.random.normal(k3, (cd,), jnp.float32) * 0.1

    v_out = jax.random.normal(k4, (D, cd), jnp.float32) * 0.3
    g_out = 0.5 + jax.random.uniform(k5, (D,), jnp.float32)
    W_out = _weight_norm(v_out, g_out)                              # (D, cd)
    bo = jax.random.normal(k6, (D,), jnp.float32) * 0.1

    win.append(W_in)                                        # (cd, D)
    b_in.append(bi[:, None])                                # (cd, 1)
    # extended out_proj: last row computes p = powers @ q (binary code)
    wext.append(jnp.concatenate([W_out, powers_row], axis=0))       # (D+1, cd)
    b_ext.append(jnp.concatenate([bo[:, None],
                                  jnp.zeros((1, 1), jnp.float32)], axis=0))

  win = jnp.stack(win)              # (n_q, cd, D)
  b_in = jnp.stack(b_in)            # (n_q, cd, 1)
  wext = jnp.stack(wext)            # (n_q, D+1, cd)
  b_ext = jnp.stack(b_ext)          # (n_q, D+1, 1)
  scales = tuple(2.0 ** (-i) for i in range(n_q))   # static Python floats
  return win, b_in, wext, b_ext, scales


# ----------------------------- pure-JAX reference -------------------------- #
def reference_forward(z, params):
  win, b_in, wext, b_ext, scales = params
  n_q, cd, D = win.shape
  wout = wext[:, :D, :]             # (n_q, D, cd)
  bout = b_ext[:, :D, :]            # (n_q, D, 1)
  powers_i = (2 ** jnp.arange(cd - 1, -1, -1)).astype(jnp.int32)    # (cd,)

  residual = z
  z_q = jnp.zeros_like(z)
  codes = []
  for i in range(n_q):
    h = jnp.einsum('cd,bdt->bct', win[i], residual,
                   precision=HIGHEST) + b_in[i][None]               # (B, cd, T)
    bits = h > 0
    q = jnp.where(bits, scales[i], -scales[i]).astype(jnp.float32)
    idx = jnp.sum(bits.astype(jnp.int32) * powers_i[None, :, None], axis=1)
    y = jnp.einsum('dc,bct->bdt', wout[i], q,
                   precision=HIGHEST) + bout[i][None]               # (B, D, T)
    z_q = z_q + y
    residual = residual - y
    codes.append(idx)
  return z_q, jnp.stack(codes, axis=1), jnp.float32(0.0)


# ---------------------------------- main ----------------------------------- #
if __name__ == "__main__":
  B, D, T = 2, 32, 16            # batch, input_dim, sequence length
  n_codebooks, codebook_size = 3, 256
  cd = int(np.log2(codebook_size))  # codebook_dim = 8

  key = jax.random.PRNGKey(0)
  kz, kp = jax.random.split(key)
  z = jax.random.normal(kz, (B, D, T), dtype=jnp.float32)
  params = init_params(kp, n_codebooks, D, cd)

  z_q, codes, loss = residual_lfq_forward(z, params)
  jax.block_until_ready((z_q, codes, loss))

  # sanity check against pure-JAX reference
  zq_ref, codes_ref, _ = reference_forward(z, params)
  assert z_q.shape == (B, D, T) and codes.shape == (B, n_codebooks, T)
  assert codes.dtype == jnp.int32  # (PyTorch would produce int64; x64 is off)
  np.testing.assert_allclose(np.asarray(z_q), np.asarray(zq_ref),
                             rtol=1e-4, atol=1e-4)
  np.testing.assert_array_equal(np.asarray(codes), np.asarray(codes_ref))
  assert float(loss) == 0.0

  print("KERNEL_OK")
</pallas_src>

<mosaic_0001>
module attributes {stable_mosaic.version = 11 : i64} {
  func.func @rlfq_kernel(%arg0: i32, %arg1: i32, %arg2: memref<1x32x128xf32, #tpu.memory_space<vmem>>, %arg3: memref<3x8x32xf32, #tpu.memory_space<vmem>>, %arg4: memref<3x8x1xf32, #tpu.memory_space<vmem>>, %arg5: memref<3x33x8xf32, #tpu.memory_space<vmem>>, %arg6: memref<3x33x1xf32, #tpu.memory_space<vmem>>, %arg7: memref<1x32x128xf32, #tpu.memory_space<vmem>>, %arg8: memref<1x3x128xi32, #tpu.memory_space<vmem>>) attributes {dimension_semantics = [#tpu.dimension_semantics<parallel>, #tpu.dimension_semantics<parallel>], iteration_bounds = array<i64: 2, 1>, scalar_prefetch = 0 : i64, scratch_operands = 0 : i64, tpu.core_type = #tpu.core_type<tc>, window_params = [{transform_indices = @transform_0, window_bounds = array<i64: 1, 32, 128>}, {pipeline_mode = #tpu.pipeline_mode<synchronous>, transform_indices = @transform_1, window_bounds = array<i64: 3, 8, 32>}, {pipeline_mode = #tpu.pipeline_mode<synchronous>, transform_indices = @transform_2, window_bounds = array<i64: 3, 8, 1>}, {pipeline_mode = #tpu.pipeline_mode<synchronous>, transform_indices = @transform_3, window_bounds = array<i64: 3, 33, 8>}, {pipeline_mode = #tpu.pipeline_mode<synchronous>, transform_indices = @transform_4, window_bounds = array<i64: 3, 33, 1>}, {transform_indices = @transform_5, window_bounds = array<i64: 1, 32, 128>}, {transform_indices = @transform_6, window_bounds = array<i64: 1, 3, 128>}]} {
    %c0 = arith.constant 0 : index
    %c0_0 = arith.constant 0 : index
    %c0_1 = arith.constant 0 : index
    %0 = vector.load %arg2[%c0, %c0_0, %c0_1] : memref<1x32x128xf32, #tpu.memory_space<vmem>>, vector<1x32x128xf32>
    %1 = vector.shape_cast %0 : vector<1x32x128xf32> to vector<32x128xf32>
    %c0_2 = arith.constant 0 : index
    %c0_3 = arith.constant 0 : index
    %c0_4 = arith.constant 0 : index
    %2 = vector.load %arg3[%c0_2, %c0_3, %c0_4] : memref<3x8x32xf32, #tpu.memory_space<vmem>>, vector<1x8x32xf32>
    %3 = vector.shape_cast %2 : vector<1x8x32xf32> to vector<8x32xf32>
    %cst = arith.constant dense<0.000000e+00> : vector<8x128xf32>
    %4 = tpu.matmul %3, %1, %cst {dimension_numbers = #tpu.dot_dimension_numbers<[1], [0], [0], [1], [0, 0, 1, 1], [], []>, precision = #tpu.contract_precision<fp32>} : vector<8x32xf32>, vector<32x128xf32>, vector<8x128xf32> -> vector<8x128xf32>
    %c0_5 = arith.constant 0 : index
    %c0_6 = arith.constant 0 : index
    %c0_7 = arith.constant 0 : index
    %5 = vector.load %arg4[%c0_5, %c0_6, %c0_7] : memref<3x8x1xf32, #tpu.memory_space<vmem>>, vector<1x8x1xf32>
    %6 = vector.shape_cast %5 : vector<1x8x1xf32> to vector<8x1xf32>
    %7 = vector.broadcast %6 : vector<8x1xf32> to vector<8x128xf32>
    %8 = arith.addf %4, %7 : vector<8x128xf32>
    %cst_8 = arith.constant 0.000000e+00 : f32
    %9 = vector.broadcast %cst_8 : f32 to vector<8x128xf32>
    %10 = arith.cmpf ogt, %8, %9 : vector<8x128xf32>
    %cst_9 = arith.constant 1.000000e+00 : f32
    %cst_10 = arith.constant -1.000000e+00 : f32
    %11 = vector.broadcast %cst_9 : f32 to vector<8x128xf32>
    %12 = vector.broadcast %cst_10 : f32 to vector<8x128xf32>
    %13 = arith.select %10, %11, %12 : vector<8x128xi1>, vector<8x128xf32>
    %c0_11 = arith.constant 0 : index
    %c0_12 = arith.constant 0 : index
    %c0_13 = arith.constant 0 : index
    %14 = vector.load %arg5[%c0_11, %c0_12, %c0_13] : memref<3x33x8xf32, #tpu.memory_space<vmem>>, vector<1x33x8xf32>
    %15 = vector.shape_cast %14 : vector<1x33x8xf32> to vector<33x8xf32>
    %cst_14 = arith.constant dense<0.000000e+00> : vector<33x128xf32>
    %16 = tpu.matmul %15, %13, %cst_14 {dimension_numbers = #tpu.dot_dimension_numbers<[1], [0], [0], [1], [0, 0, 1, 1], [], []>, precision = #tpu.contract_precision<fp32>} : vector<33x8xf32>, vector<8x128xf32>, vector<33x128xf32> -> vector<33x128xf32>
    %c0_15 = arith.constant 0 : index
    %c0_16 = arith.constant 0 : index
    %c0_17 = arith.constant 0 : index
    %17 = vector.load %arg6[%c0_15, %c0_16, %c0_17] : memref<3x33x1xf32, #tpu.memory_space<vmem>>, vector<1x33x1xf32>
    %18 = vector.shape_cast %17 : vector<1x33x1xf32> to vector<33x1xf32>
    %19 = vector.broadcast %18 : vector<33x1xf32> to vector<33x128xf32>
    %20 = arith.addf %16, %19 : vector<33x128xf32>
    %21 = vector.extract_strided_slice %20 {offsets = [0, 0], sizes = [32, 128], strides = [1, 1]} : vector<33x128xf32> to vector<32x128xf32>
    %22 = arith.subf %1, %21 : vector<32x128xf32>
    %23 = vector.extract_strided_slice %20 {offsets = [32, 0], sizes = [1, 128], strides = [1, 1]} : vector<33x128xf32> to vector<1x128xf32>
    %cst_18 = arith.constant 5.000000e-01 : f32
    %24 = vector.broadcast %cst_18 : f32 to vector<1x128xf32>
    %25 = arith.mulf %23, %24 : vector<1x128xf32>
    %cst_19 = arith.constant 1.275000e+02 : f32
    %26 = vector.broadcast %cst_19 : f32 to vector<1x128xf32>
    %27 = arith.addf %25, %26 : vector<1x128xf32>
    %28 = arith.fptosi %27 : vector<1x128xf32> to vector<1x128xi32>
    %c0_20 = arith.constant 0 : index
    %c0_21 = arith.constant 0 : index
    %c0_22 = arith.constant 0 : index
    %29 = vector.load %arg8[%c0_20, %c0_21, %c0_22] : memref<1x3x128xi32, #tpu.memory_space<vmem>>, vector<1x1x128xi32>
    %30 = vector.shape_cast %29 : vector<1x1x128xi32> to vector<1x128xi32>
    %31 = vector.shape_cast %28 : vector<1x128xi32> to vector<1x1x128xi32>
    tpu.vector_store %arg8[%c0_20, %c0_21, %c0_22], %31 {strides = array<i32>} : memref<1x3x128xi32, #tpu.memory_space<vmem>>, vector<1x1x128xi32>,
    %c1 = arith.constant 1 : index
    %c0_23 = arith.constant 0 : index
    %c0_24 = arith.constant 0 : index
    %32 = vector.load %arg3[%c1, %c0_23, %c0_24] : memref<3x8x32xf32, #tpu.memory_space<vmem>>, vector<1x8x32xf32>
    %33 = vector.shape_cast %32 : vector<1x8x32xf32> to vector<8x32xf32>
    %cst_25 = arith.constant dense<0.000000e+00> : vector<8x128xf32>
    %34 = tpu.matmul %33, %22, %cst_25 {dimension_numbers = #tpu.dot_dimension_numbers<[1], [0], [0], [1], [0, 0, 1, 1], [], []>, precision = #tpu.contract_precision<fp32>} : vector<8x32xf32>, vector<32x128xf32>, vector<8x128xf32> -> vector<8x128xf32>
    %c1_26 = arith.constant 1 : index
    %c0_27 = arith.constant 0 : index
    %c0_28 = arith.constant 0 : index
    %35 = vector.load %arg4[%c1_26, %c0_27, %c0_28] : memref<3x8x1xf32, #tpu.memory_space<vmem>>, vector<1x8x1xf32>
    %36 = vector.shape_cast %35 : vector<1x8x1xf32> to vector<8x1xf32>
    %37 = vector.broadcast %36 : vector<8x1xf32> to vector<8x128xf32>
    %38 = arith.addf %34, %37 : vector<8x128xf32>
    %cst_29 = arith.constant 0.000000e+00 : f32
    %39 = vector.broadcast %cst_29 : f32 to vector<8x128xf32>
    %40 = arith.cmpf ogt, %38, %39 : vector<8x128xf32>
    %cst_30 = arith.constant 5.000000e-01 : f32
    %cst_31 = arith.constant -5.000000e-01 : f32
    %41 = vector.broadcast %cst_30 : f32 to vector<8x128xf32>
    %42 = vector.broadcast %cst_31 : f32 to vector<8x128xf32>
    %43 = arith.select %40, %41, %42 : vector<8x128xi1>, vector<8x128xf32>
    %c1_32 = arith.constant 1 : index
    %c0_33 = arith.constant 0 : index
    %c0_34 = arith.constant 0 : index
    %44 = vector.load %arg5[%c1_32, %c0_33, %c0_34] : memref<3x33x8xf32, #tpu.memory_space<vmem>>, vector<1x33x8xf32>
    %45 = vector.shape_cast %44 : vector<1x33x8xf32> to vector<33x8xf32>
    %cst_35 = arith.constant dense<0.000000e+00> : vector<33x128xf32>
    %46 = tpu.matmul %45, %43, %cst_35 {dimension_numbers = #tpu.dot_dimension_numbers<[1], [0], [0], [1], [0, 0, 1, 1], [], []>, precision = #tpu.contract_precision<fp32>} : vector<33x8xf32>, vector<8x128xf32>, vector<33x128xf32> -> vector<33x128xf32>
    %c1_36 = arith.constant 1 : index
    %c0_37 = arith.constant 0 : index
    %c0_38 = arith.constant 0 : index
    %47 = vector.load %arg6[%c1_36, %c0_37, %c0_38] : memref<3x33x1xf32, #tpu.memory_space<vmem>>, vector<1x33x1xf32>
    %48 = vector.shape_cast %47 : vector<1x33x1xf32> to vector<33x1xf32>
    %49 = vector.broadcast %48 : vector<33x1xf32> to vector<33x128xf32>
    %50 = arith.addf %46, %49 : vector<33x128xf32>
    %51 = vector.extract_strided_slice %50 {offsets = [0, 0], sizes = [32, 128], strides = [1, 1]} : vector<33x128xf32> to vector<32x128xf32>
    %52 = arith.subf %22, %51 : vector<32x128xf32>
    %53 = vector.extract_strided_slice %50 {offsets = [32, 0], sizes = [1, 128], strides = [1, 1]} : vector<33x128xf32> to vector<1x128xf32>
    %cst_39 = arith.constant 1.000000e+00 : f32
    %54 = vector.broadcast %cst_39 : f32 to vector<1x128xf32>
    %55 = arith.mulf %53, %54 : vector<1x128xf32>
    %cst_40 = arith.constant 1.275000e+02 : f32
    %56 = vector.broadcast %cst_40 : f32 to vector<1x128xf32>
    %57 = arith.addf %55, %56 : vector<1x128xf32>
    %58 = arith.fptosi %57 : vector<1x128xf32> to vector<1x128xi32>
    %c0_41 = arith.constant 0 : index
    %c1_42 = arith.constant 1 : index
    %c0_43 = arith.constant 0 : index
    %59 = vector.load %arg8[%c0_41, %c1_42, %c0_43] : memref<1x3x128xi32, #tpu.memory_space<vmem>>, vector<1x1x128xi32>
    %60 = vector.shape_cast %59 : vector<1x1x128xi32> to vector<1x128xi32>
    %61 = vector.shape_cast %58 : vector<1x128xi32> to vector<1x1x128xi32>
    tpu.vector_store %arg8[%c0_41, %c1_42, %c0_43], %61 {strides = array<i32>} : memref<1x3x128xi32, #tpu.memory_space<vmem>>, vector<1x1x128xi32>,
    %c2 = arith.constant 2 : index
    %c0_44 = arith.constant 0 : index
    %c0_45 = arith.constant 0 : index
    %62 = vector.load %arg3[%c2, %c0_44, %c0_45] : memref<3x8x32xf32, #tpu.memory_space<vmem>>, vector<1x8x32xf32>
    %63 = vector.shape_cast %62 : vector<1x8x32xf32> to vector<8x32xf32>
    %cst_46 = arith.constant dense<0.000000e+00> : vector<8x128xf32>
    %64 = tpu.matmul %63, %52, %cst_46 {dimension_numbers = #tpu.dot_dimension_numbers<[1], [0], [0], [1], [0, 0, 1, 1], [], []>, precision = #tpu.contract_precision<fp32>} : vector<8x32xf32>, vector<32x128xf32>, vector<8x128xf32> -> vector<8x128xf32>
    %c2_47 = arith.constant 2 : index
    %c0_48 = arith.constant 0 : index
    %c0_49 = arith.constant 0 : index
    %65 = vector.load %arg4[%c2_47, %c0_48, %c0_49] : memref<3x8x1xf32, #tpu.memory_space<vmem>>, vector<1x8x1xf32>
    %66 = vector.shape_cast %65 : vector<1x8x1xf32> to vector<8x1xf32>
    %67 = vector.broadcast %66 : vector<8x1xf32> to vector<8x128xf32>
    %68 = arith.addf %64, %67 : vector<8x128xf32>
    %cst_50 = arith.constant 0.000000e+00 : f32
    %69 = vector.broadcast %cst_50 : f32 to vector<8x128xf32>
    %70 = arith.cmpf ogt, %68, %69 : vector<8x128xf32>
    %cst_51 = arith.constant 2.500000e-01 : f32
    %cst_52 = arith.constant -2.500000e-01 : f32
    %71 = vector.broadcast %cst_51 : f32 to vector<8x128xf32>
    %72 = vector.broadcast %cst_52 : f32 to vector<8x128xf32>
    %73 = arith.select %70, %71, %72 : vector<8x128xi1>, vector<8x128xf32>
    %c2_53 = arith.constant 2 : index
    %c0_54 = arith.constant 0 : index
    %c0_55 = arith.constant 0 : index
    %74 = vector.load %arg5[%c2_53, %c0_54, %c0_55] : memref<3x33x8xf32, #tpu.memory_space<vmem>>, vector<1x33x8xf32>
    %75 = vector.shape_cast %74 : vector<1x33x8xf32> to vector<33x8xf32>
    %cst_56 = arith.constant dense<0.000000e+00> : vector<33x128xf32>
    %76 = tpu.matmul %75, %73, %cst_56 {dimension_numbers = #tpu.dot_dimension_numbers<[1], [0], [0], [1], [0, 0, 1, 1], [], []>, precision = #tpu.contract_precision<fp32>} : vector<33x8xf32>, vector<8x128xf32>, vector<33x128xf32> -> vector<33x128xf32>
    %c2_57 = arith.constant 2 : index
    %c0_58 = arith.constant 0 : index
    %c0_59 = arith.constant 0 : index
    %77 = vector.load %arg6[%c2_57, %c0_58, %c0_59] : memref<3x33x1xf32, #tpu.memory_space<vmem>>, vector<1x33x1xf32>
    %78 = vector.shape_cast %77 : vector<1x33x1xf32> to vector<33x1xf32>
    %79 = vector.broadcast %78 : vector<33x1xf32> to vector<33x128xf32>
    %80 = arith.addf %76, %79 : vector<33x128xf32>
    %81 = vector.extract_strided_slice %80 {offsets = [0, 0], sizes = [32, 128], strides = [1, 1]} : vector<33x128xf32> to vector<32x128xf32>
    %82 = arith.subf %52, %81 : vector<32x128xf32>
    %83 = vector.extract_strided_slice %80 {offsets = [32, 0], sizes = [1, 128], strides = [1, 1]} : vector<33x128xf32> to vector<1x128xf32>
    %cst_60 = arith.constant 2.000000e+00 : f32
    %84 = vector.broadcast %cst_60 : f32 to vector<1x128xf32>
    %85 = arith.mulf %83, %84 : vector<1x128xf32>
    %cst_61 = arith.constant 1.275000e+02 : f32
    %86 = vector.broadcast %cst_61 : f32 to vector<1x128xf32>
    %87 = arith.addf %85, %86 : vector<1x128xf32>
    %88 = arith.fptosi %87 : vector<1x128xf32> to vector<1x128xi32>
    %c0_62 = arith.constant 0 : index
    %c2_63 = arith.constant 2 : index
    %c0_64 = arith.constant 0 : index
    %89 = vector.load %arg8[%c0_62, %c2_63, %c0_64] : memref<1x3x128xi32, #tpu.memory_space<vmem>>, vector<1x1x128xi32>
    %90 = vector.shape_cast %89 : vector<1x1x128xi32> to vector<1x128xi32>
    %91 = vector.shape_cast %88 : vector<1x128xi32> to vector<1x1x128xi32>
    tpu.vector_store %arg8[%c0_62, %c2_63, %c0_64], %91 {strides = array<i32>} : memref<1x3x128xi32, #tpu.memory_space<vmem>>, vector<1x1x128xi32>,
    %c0_65 = arith.constant 0 : index
    %c0_66 = arith.constant 0 : index
    %c0_67 = arith.constant 0 : index
    %92 = vector.load %arg2[%c0_65, %c0_66, %c0_67] : memref<1x32x128xf32, #tpu.memory_space<vmem>>, vector<1x32x128xf32>
    %93 = vector.shape_cast %92 : vector<1x32x128xf32> to vector<32x128xf32>
    %94 = arith.subf %93, %82 : vector<32x128xf32>
    %c0_68 = arith.constant 0 : index
    %c0_69 = arith.constant 0 : index
    %c0_70 = arith.constant 0 : index
    %95 = vector.load %arg7[%c0_68, %c0_69, %c0_70] : memref<1x32x128xf32, #tpu.memory_space<vmem>>, vector<1x32x128xf32>
    %96 = vector.shape_cast %95 : vector<1x32x128xf32> to vector<32x128xf32>
    %97 = vector.shape_cast %94 : vector<32x128xf32> to vector<1x32x128xf32>
    tpu.vector_store %arg7[%c0_68, %c0_69, %c0_70], %97 {strides = array<i32>} : memref<1x32x128xf32, #tpu.memory_space<vmem>>, vector<1x32x128xf32>,
    return
  }
  func.func @transform_0(%arg0: i32, %arg1: i32) -> (i32, i32, i32) {
    %c0_i32 = arith.constant 0 : i32
    %c0_i32_0 = arith.constant 0 : i32
    return %arg0, %c0_i32, %arg1 : i32, i32, i32
  }
  func.func @transform_1(%arg0: i32, %arg1: i32) -> (i32, i32, i32) {
    %c0_i32 = arith.constant 0 : i32
    %c0_i32_0 = arith.constant 0 : i32
    %c0_i32_1 = arith.constant 0 : i32
    %c0_i32_2 = arith.constant 0 : i32
    return %c0_i32, %c0_i32_0, %c0_i32_1 : i32, i32, i32
  }
  func.func @transform_2(%arg0: i32, %arg1: i32) -> (i32, i32, i32) {
    %c0_i32 = arith.constant 0 : i32
    %c0_i32_0 = arith.constant 0 : i32
    %c0_i32_1 = arith.constant 0 : i32
    %c0_i32_2 = arith.constant 0 : i32
    return %c0_i32, %c0_i32_0, %c0_i32_1 : i32, i32, i32
  }
  func.func @transform_3(%arg0: i32, %arg1: i32) -> (i32, i32, i32) {
    %c0_i32 = arith.constant 0 : i32
    %c0_i32_0 = arith.constant 0 : i32
    %c0_i32_1 = arith.constant 0 : i32
    %c0_i32_2 = arith.constant 0 : i32
    return %c0_i32, %c0_i32_0, %c0_i32_1 : i32, i32, i32
  }
  func.func @transform_4(%arg0: i32, %arg1: i32) -> (i32, i32, i32) {
    %c0_i32 = arith.constant 0 : i32
    %c0_i32_0 = arith.constant 0 : i32
    %c0_i32_1 = arith.constant 0 : i32
    %c0_i32_2 = arith.constant 0 : i32
    return %c0_i32, %c0_i32_0, %c0_i32_1 : i32, i32, i32
  }
  func.func @transform_5(%arg0: i32, %arg1: i32) -> (i32, i32, i32) {
    %c0_i32 = arith.constant 0 : i32
    %c0_i32_0 = arith.constant 0 : i32
    return %arg0, %c0_i32, %arg1 : i32, i32, i32
  }
  func.func @transform_6(%arg0: i32, %arg1: i32) -> (i32, i32, i32) {
    %c0_i32 = arith.constant 0 : i32
    %c0_i32_0 = arith.constant 0 : i32
    return %arg0, %c0_i32, %arg1 : i32, i32, i32
  }
}

</mosaic_0001>

<bundles_post_ra>
// kernel: tpu_custom_call.1
= control target key start
LH: loop header
LB: loop body
LE: loop exit
PB: predicated region body
PF: predicated region fallthrough
CT: control target
= control target key end

     0   :  { %12 = vsyncpa [#allocation3], 0  ;;  %s5866_s0 = inlined_call_operand.vmem [shape: f32[2,32,128], index: 0, kind: input, shape index: {}]   ;;  %s5867_s1 = inlined_call_operand.vmem [shape: f32[3,8,32], index: 1, kind: input, shape index: {}]   ;;  %s5868_s2 = inlined_call_operand.vmem [shape: f32[3,8,1], index: 2, kind: input, shape index: {}]   ;;  %s5869_s3 = inlined_call_operand.vmem [shape: f32[3,33,8], index: 3, kind: input, shape index: {}]   ;;  %s5870_s4 = inlined_call_operand.vmem [shape: f32[3,33,1], index: 4, kind: input, shape index: {}]   ;;  %s5871_s5 = inlined_call_operand.hbm [shape: f32[2,32,128], index: 5, kind: output, shape index: {0}]   ;;  %s5872_s6 = inlined_call_operand.vmem [shape: s32[2,3,128], index: 6, kind: output, shape index: {1}]  }
   0x1   :  { %14 = vsyncpa [#allocation3 + $0x1], 0  ;;  %s4889_s21 = smov 0   ;;  %s4891_s22 = smov 0  }
   0x2   :  { %s4893_s23 = smov 0   ;;  %s4895_s24 = smov 0  }
   0x3   :  { %s4897_s25 = smov 0   ;;  %s4899_s26 = smov 0  }
   0x4 LB: > { %s3954_s27 = sadd.s32 4294967295, %s4843_s26   ;;  %s3955_s28 = sadd.s32 4294967294, %s4843_s26   ;;  %s4843_s26 = sphi %s4899_s26, %s20_s26   ;;  %s4839_s25 = sphi %s4897_s25, %s5879_s25   ;;  %s4835_s24 = sphi %s4895_s24, %s5878_s24   ;;  %s4831_s23 = sphi %s4893_s23, %s5877_s23   ;;  %s4827_s22 = sphi %s4891_s22, %s5876_s22   ;;  %s4823_s21 = sphi %s4889_s21, %s5875_s21  }
   0x5   : > { %s32_s29 = sadd.s32 1, %s4839_s25  ;;  %s153_s30 = sadd.s32 1, %s4831_s23 }
   0x6   : > { %p34_p0 = scmp.ge.s32.totalorder %s32_s29, 2  ;;  %p163_p1 = scmp.ne.s32.totalorder %s4831_s23, %s4827_s22 }
   0x7   : > { %p164_p2 = scmp.eq.s32.totalorder %s3954_s27, 1  ;;  %p169_p3 = scmp.ne.s32.totalorder %s4827_s22, %s4823_s21 }
   0x8   : > { %s5881_s29 = smov (%p34_p0, %s32_s29), 0  ;;  %p170_p5 = scmp.eq.s32.totalorder %s3955_s28, 1 }
   0x9   : > { %p4929_p4 = por %p164_p2, %p163_p1  ;;  %s148_s8 = ssub.s32 %s4839_s25, %s5881_s29 }
   0xa   : > { %p3958_p6 = scmp.ge.s32.totalorder %s4843_s26, 1  ;;  %p151_p7 = scmp.eq.s32.totalorder %s148_s8, 0 }
   0xb   : > { %p4936_p8 = por %p170_p5, %p169_p3  ;;  %p239_p9 = scmp.lt.s32.totalorder %s4843_s26, 3 }
   0xc   : > { %s4942_s10 = scalar_select %p151_p7, %s4831_s23, %s153_s30  }
   0xd   : > { %p240_p10 = pnand %p3958_p6, %p239_p9 }
   0xe   : > { %p279_p11 = scmp.lt.s32.totalorder (!%p240_p10), %s4835_s24, 1  ;;  %s267_s18 = sand.u32 (!%p240_p10), 1, %s4827_s22  }
   0xf   : > { %243 = sbr.rel (%p240_p10) target bundleno = 1516 (0x5ec), region = 40  ;;  %s3959_s20 = sshll.u32 (!%p240_p10), %s267_s18, 5 }
  0x10   : > { %s5796_s27 = scalar_lea.vmem (!%p240_p10), [#allocation2], %s3959_s20  ;;  %s3993_s30 = sshll.u32 (!%p240_p10), %s4835_s24, 9 }
  0x11   : > { %s3842_s28 = sshll.u32 (!%p240_p10), %s5796_s27, 4  ;;  %s5815_s12 = scalar_lea.hbm (!%p240_p10), %s5871_s5, %s3993_s30  ;;  %s5810_s28 = int_to_ptr.vmem [resolvable:$true] %s3842_s28 }
  0x12   : > { %s4851_s13 = smov (!%p240_p10), [#allocation2]  }
  0x13   : > { %s4771_s14 = sshll.u32 (!%p240_p10), %s4851_s13, 4  ;;  %s4772_s14 = int_to_ptr.vmem [resolvable:$false] %s4771_s14 }
  0x14   : > { %v298_v0 = vld [vmem:[%s5867_s1] sm:$0xff]  ;;  %vm305_vm0 = vcmask 261120   ;;  %v4845_v1 = vmov 0.0   ;;  %s4955_s15 = scalar_select %p279_p11, %s4835_s24, 1  ;;  %vm4846_vm1 = vmmov 0   ;;  %v4847_v5 = vmov 0  }
  0x15   : > { %4192 = vmatprep.subr.mxu0 %v4845_v1  ;;  %4203 = vmatprep.subr.mxu1 %v4845_v1  ;;  %v307_v2 = vsel %vm305_vm0, %v298_v0, 0  ;;  %v299_v3 = vld [vmem:[%s5868_s2] sm:$0xff]  ;;  %v804_v7 = vld [vmem:[%s5870_s4 + $0x18] sm:$0xff]  ;;  %v3971_v37 = vld [vmem:[%s5870_s4 + $0x30] sm:$0xff]  ;;  %vm831_vm2 = vcmask 64512   ;;  %s5820_s24 = scalar_lea.sflag [#allocation3], %s267_s18  ;;  %p4774_p1 = scmp.lt.s32.totalorder %s5810_s28, %s4772_s14 }
  0x16   : > { %4200 = vmatprep.mubr.msk.f32.mxu0 %vm4846_vm1, %v4845_v1  ;;  %v4959_v4 = vand.u32 4294901760, %v307_v2  ;;  %4211 = vmatprep.mubr.msk.f32.mxu1 %vm4846_vm1, %v4845_v1  ;;  %s3992_s16 = sshll.u32 %s4955_s15, 5  ;;  %v801_v21 = vld [vmem:[%s5870_s4] sm:$0xff]  ;;  %v3976_v38 = vld [vmem:[%s5868_s2 + $0x10] sm:$0xff]  ;;  %v802_v43 = vld [vmem:[%s5870_s4 + $0x8] sm:$0xff]  ;;  %s3962_s17 = sshll.u32 %s4955_s15, 2 }
  0x17   : > { %4765 = vset.pattern.permute.xlu0 %v4847_v5  ;;  %4766 = vset.pattern.permute.xlu1 %v4847_v5  ;;  %s4970_s19 = scalar_lea.vmem %s5866_s0, %s3992_s16  ;;  %v3973_v36 = vld [vmem:[%s5870_s4 + $0x40] sm:$0xff]  ;;  %v3986_v39 = vld [vmem:[%s5870_s4 + $0x70] sm:$0x1]  ;;  %v3964_v44 = vld [vmem:[%s5868_s2 + $0x8] sm:$0xff]  ;;  %s5334_s15 = scalar_lea.vmem %s5872_s6, %s3962_s17 }
  0x18   : > { %v4965_v6 = vsub.f32 %v307_v2, %v4959_v4  ;;  %302 = vperm.xlu0 %4765, %v299_v3   ;;  %v4976_v8 = vld [vmem:[%s4970_s19 + $0x18] sm:$0xff]  ;;  %v4979_v9 = vld [vmem:[%s4970_s19 + $0x10] sm:$0xff]  ;;  %v4982_v10 = vld [vmem:[%s4970_s19 + $0x8] sm:$0xff]  ;;  %s4773_s16 = scalar_lea.vmem %s4772_s14, 1024 }
  0x19   : > { %v4986_v12 = vand.u32 4294901760, %v4976_v8  ;;  %v4989_v13 = vand.u32 4294901760, %v4979_v9  ;;  %v4992_v14 = vand.u32 4294901760, %v4982_v10  ;;  %v4995_v15 = vld [vmem:[%s4970_s19] sm:$0xff]  ;;  %v3982_v40 = vld [vmem:[%s5870_s4 + $0x50] sm:$0xff]  ;;  %v3972_v45 = vld [vmem:[%s5870_s4 + $0x38] sm:$0xff] }
  0x1a   : > { %v380_v11 = vand.u32 4294901760, %v4965_v6  ;;  %v4998_v16 = vand.u32 4294901760, %v4995_v15  ;;  %v3984_v41 = vld [vmem:[%s5870_s4 + $0x60] sm:$0xff]  ;;  %v803_v42 = vld [vmem:[%s5870_s4 + $0x10] sm:$0xff]  ;;  %v3970_v46 = vld [vmem:[%s5870_s4 + $0x28] sm:$0xff] }
  0x1b   : > { %4193 = vmatpush3.msra.mxu0 %v4986_v12  ;;  %v414_v18 = vsub.f32 %v4976_v8, %v4986_v12  ;;  %v421_v19 = vsub.f32 %v4979_v9, %v4989_v13  ;;  %v428_v20 = vsub.f32 %v4982_v10, %v4992_v14  ;;  %818 = vperm.xlu1 %4766, %v803_v42   ;;  %v805_v47 = vld [vmem:[%s5870_s4 + $0x20] sm:$0x1]  ;;  %v3974_v48 = vld [vmem:[%s5870_s4 + $0x48] sm:$0x1]  ;;  %v3983_v49 = vld [vmem:[%s5870_s4 + $0x58] sm:$0xff] }
  0x1c   : > { %v381_v17 = vsub.f32 %v4965_v6, %v380_v11  ;;  %823 = vperm.xlu0 %4765, %v804_v7   ;;  %4194 = vmatprep.subr.mxu0 %v4845_v1  ;;  %v435_v22 = vsub.f32 %v4995_v15, %v4998_v16  ;;  %v3985_v50 = vld [vmem:[%s5870_s4 + $0x68] sm:$0xff]  ;;  %v796_v53 = vld [vmem:[%s5869_s3] sm:$0xff]  ;;  %v798_v0 = vld [vmem:[%s5869_s3 + $0x10] sm:$0xff] }
  0x1d   : > { %4195 = vmatpush3.msra.mxu0 %v4989_v13  ;;  %v415_v23 = vand.u32 4294901760, %v414_v18  ;;  %v422_v24 = vand.u32 4294901760, %v421_v19  ;;  %v429_v25 = vand.u32 4294901760, %v428_v20  ;;  %v833_v55 = vsel %vm831_vm2, %v796_v53, 0  ;;  %v797_v58 = vld [vmem:[%s5869_s3 + $0x8] sm:$0xff]  ;;  %v799_v7 = vld [vmem:[%s5869_s3 + $0x18] sm:$0xff] }
  0x1e   : > { %4196 = vmatprep.subr.mxu0 %v4845_v1  ;;  %v382_v26 = vand.u32 4294901760, %v381_v17  ;;  %v436_v27 = vand.u32 4294901760, %v435_v22  ;;  %v5120_v61 = vand.u32 4294901760, %v833_v55  ;;  %v836_v63 = vsel %vm831_vm2, %v797_v58, 0 }
  0x1f   : > { %4197 = vmatpush3.msra.mxu0 %v4992_v14  ;;  %v416_v28 = vsub.f32 %v414_v18, %v415_v23  ;;  %v423_v29 = vsub.f32 %v421_v19, %v422_v24  ;;  %v430_v30 = vsub.f32 %v428_v20, %v429_v25  ;;  %813 = vperm.xlu1 %4766, %v802_v43  }
  0x20   : > { %808 = vperm.xlu0 %4765, %v801_v21   ;;  %4198 = vmatprep.subr.mxu0 %v4845_v1  ;;  %v437_v33 = vsub.f32 %v435_v22, %v436_v27  ;;  %v5127_v3 = vsub.f32 %v833_v55, %v5120_v61  ;;  %v800_v21 = vld [vmem:[%s5869_s3 + $0x20] sm:$0x1] }
  0x21   : > { %4199 = vmatpush3.msra.mxu0 %v4998_v16  ;;  %v417_v31 = vand.u32 4294901760, %v416_v28  ;;  %v424_v32 = vand.u32 4294901760, %v423_v29  ;;  %v431_v34 = vand.u32 4294901760, %v430_v30 }
  0x22   : > { %4214 = vmatprep.subr.mxu0 %v4845_v1  ;;  %4201 = vmatmul.mubr.f32.vlgmr.msra.gmra.mxu0 %v382_v26  ;;  %v438_v35 = vand.u32 4294901760, %v437_v33 }
  0x23   : > { %4204 = vmatpush3.msra.mxu1 %v417_v31  ;;  %4215 = vmatpush3.msra.mxu0 %v414_v18 }
  0x24   : > { %4205 = vmatprep.subr.mxu1 %v4845_v1  ;;  %4216 = vmatprep.subr.mxu0 %v4845_v1 }
  0x25   : > { %4206 = vmatpush3.msra.mxu1 %v424_v32  ;;  %4217 = vmatpush3.msra.mxu0 %v421_v19  ;;  %v842_v19 = vsel %vm831_vm2, %v799_v7, 0 }
  0x26   : > { %4207 = vmatprep.subr.mxu1 %v4845_v1  ;;  %4218 = vmatprep.subr.mxu0 %v4845_v1 }
  0x27   : > { %4208 = vmatpush3.msra.mxu1 %v431_v34  ;;  %4219 = vmatpush3.msra.mxu0 %v428_v20 }
  0x28   : > { %4209 = vmatprep.subr.mxu1 %v4845_v1  ;;  %4220 = vmatprep.subr.mxu0 %v4845_v1 }
  0x29   : > { %4210 = vmatpush3.msra.mxu1 %v438_v35  ;;  %4221 = vmatpush3.msra.mxu0 %v435_v22 }
  0x2a   : > { %4212 = vmatmul.mubr.f32.vlgmr.msra.gmra.mxu1 %v4959_v4  ;;  %4225 = vmatprep.subr.mxu1 %v4845_v1 }
  0x2b   : > { %4226 = vmatpush3.msra.mxu1 %v4986_v12  ;;  %4222 = vmatprep.mubr.msk.f32.mxu0 %vm4846_vm1, %v4845_v1 }
  0x2c   : > { %4227 = vmatprep.subr.mxu1 %v4845_v1  ;;  %4236 = vmatprep.subr.mxu0 %v4845_v1 }
  0x2d   : > { %4223 = vmatmul.mubr.f32.vlgmr.msra.gmra.mxu0 %v4965_v6  ;;  %4228 = vmatpush3.msra.mxu1 %v4989_v13  ;;  %v839_v6 = vsel %vm831_vm2, %v798_v0, 0 }
  0x2e   : > { %4237 = vmatpush3.msra.mxu0 %v415_v23  ;;  %4229 = vmatprep.subr.mxu1 %v4845_v1  ;;  %v5139_v17 = vand.u32 4294901760, %v839_v6 }
  0x2f   : > { %4238 = vmatprep.subr.mxu0 %v4845_v1  ;;  %4230 = vmatpush3.msra.mxu1 %v4992_v14 }
  0x30   : > { %4239 = vmatpush3.msra.mxu0 %v422_v24  ;;  %4231 = vmatprep.subr.mxu1 %v4845_v1  ;;  %v5150_v24 = vsub.f32 %v839_v6, %v5139_v17 }
  0x31   : > { %4240 = vmatprep.subr.mxu0 %v4845_v1  ;;  %4232 = vmatpush3.msra.mxu1 %v4998_v16 }
  0x32   : > { %4233 = vmatprep.mubr.msk.f32.mxu1 %vm4846_vm1, %v4845_v1  ;;  %4241 = vmatpush3.msra.mxu0 %v429_v25  ;;  %v5152_v25 = vand.u32 4294901760, %v842_v19  ;;  %v934_v33 = vand.u32 4294901760, %v5150_v24 }
  0x33   : > { %4234 = vmatmul.mubr.f32.vlgmr.msra.gmra.mxu1 %v380_v11  ;;  %4242 = vmatprep.subr.mxu0 %v4845_v1 }
  0x34   : > { %4247 = vmatprep.subr.mxu1 %v4845_v1  ;;  %4243 = vmatpush3.msra.mxu0 %v436_v27  ;;  %v845_v27 = vsel %vm831_vm2, %v800_v21, 0  ;;  %v5160_v34 = vsub.f32 %v842_v19, %v5152_v25 }
  0x35   : > { %4244 = vmatprep.mubr.msk.f32.mxu0 %vm4846_vm1, %v4845_v1  ;;  %4248 = vmatpush3.msra.mxu1 %v4986_v12  ;;  %v5162_v35 = vand.u32 4294901760, %v845_v27 }
  0x36   : > { %4245 = vmatmul.mubr.f32.vlgmr.msra.gmra.mxu0 %v4959_v4  ;;  %4249 = vmatprep.subr.mxu1 %v4845_v1 }
  0x37   : > { %4250 = vmatpush3.msra.mxu1 %v4989_v13  ;;  %4255 = vmatprep.mubr.msk.f32.mxu1 %vm4846_vm1, %v4845_v1  ;;  %v914_v13 = vand.u32 4294901760, %v5127_v3  ;;  %v953_v42 = vsub.f32 %v845_v27, %v5162_v35 }
  0x38   : > { %4251 = vmatprep.subr.mxu1 %v4845_v1  ;;  %1995 = vperm.xlu0 %4765, %v3973_v36   ;;  %v4848_v36 = vmov -1.0  }
  0x39   : > { %4252 = vmatpush3.msra.mxu1 %v4992_v14  ;;  %4258 = vmatprep.subr.mxu0 %v4845_v1  ;;  %v915_v22 = vsub.f32 %v5127_v3, %v914_v13 }
  0x3a   : > { %4253 = vmatprep.subr.mxu1 %v4845_v1  ;;  %4260 = vmatprep.mubr.msk.f32.mxu0 %vm4846_vm1, %v4845_v1 }
  0x3b   : > { %4254 = vmatpush3.msra.mxu1 %v4998_v16  ;;  %1473 = vperm.xlu1 %4766, %v3964_v44   ;;  %v916_v30 = vand.u32 4294901760, %v915_v22 }
  0x3c   : > { %4256 = vmatmul.mubr.f32.vlgmr.msra.gmra.mxu1 %v4959_v4  ;;  %1985 = vperm.xlu0 %4765, %v3971_v37   ;;  %v5129_v4 = vand.u32 4294901760, %v836_v63 }
  0x3d   : > { %4275 = vmatprep.subr.mxu1 %v4845_v1  ;;  %4277 = vmatprep.mubr.msk.f32.mxu1 %vm4846_vm1, %v4845_v1 }
  0x3e   : > { %v5137_v16 = vsub.f32 %v836_v63, %v5129_v4 }
  0x3f   : > { %1990 = vperm.xlu1 %4766, %v3972_v45  }
  0x40   : > { %2643 = vperm.xlu0 %4765, %v3976_v38   ;;  %v924_v23 = vand.u32 4294901760, %v5137_v16 }
  0x42   : > { %v925_v32 = vsub.f32 %v5137_v16, %v924_v23 }
  0x43   : > { %1980 = vperm.xlu1 %4766, %v3970_v46  }
  0x44   : > { %3170 = vperm.xlu0 %4765, %v3986_v39   ;;  %v926_v39 = vand.u32 4294901760, %v925_v32 }
  0x47   : > { %828 = vperm.xlu1 %4766, %v805_v47   ;;  %v954_v47 = vand.u32 4294901760, %v953_v42 }
  0x48   : > { %3150 = vperm.xlu0 %4765, %v3982_v40   ;;  %v935_v40 = vsub.f32 %v5150_v24, %v934_v33 }
  0x4a   : > { %v936_v45 = vand.u32 4294901760, %v935_v40 }
  0x4b   : > { %2000 = vperm.xlu1 %4766, %v3974_v48  }
  0x4c   : > { %3160 = vperm.xlu0 %4765, %v3984_v41   ;;  %v944_v41 = vand.u32 4294901760, %v5160_v34 }
  0x4e   : > { %v945_v46 = vsub.f32 %v5160_v34, %v944_v41 }
  0x4f   : > { %3155 = vperm.xlu1 %4766, %v3983_v49  }
  0x50   : > { %v946_v49 = vand.u32 4294901760, %v945_v46 }
  0x53   : > { %3165 = vperm.xlu1 %4766, %v3985_v50   ;;  %v955_v50 = vsub.f32 %v953_v42, %v954_v47 }
  0x93   : > { %v303_v56 = vpop.permute.xlu0 %302 }
  0xe2   : > { %v384_v51 = vpop.f32.mrf.mxu0 }
  0xe3   : > { %v385_v59 = vadd.f32 %v384_v51, %v303_v56  ;;  %v956_v51 = vand.u32 4294901760, %v955_v50 }
  0xe4   : > { %v4202_v52 = vpop.f32.mrf.mxu0 }
  0xea   : > { %v475_v54 = vpop.f32.mrf.mxu1 }
  0xeb   : > { %v476_v2 = vadd.f32 %v475_v54, %v385_v59 }
  0xec   : > { %v4213_v57 = vpop.f32.mrf.mxu1 }
  0xed   : > { %v555_v60 = vpop.f32.mrf.mxu0 }
  0xee   : > { %v556_v11 = vadd.f32 %v555_v60, %v476_v2 }
  0xef   : > { %v4224_v62 = vpop.f32.mrf.mxu0 }
  0xf3   : > { %v632_v5 = vpop.f32.mrf.mxu1 }
  0xf4   : > { %v633_v18 = vadd.f32 %v632_v5, %v556_v11  ;;  %v819_v5 = vpop.permute.xlu1 %818 }
  0xf5   : > { %v4235_v12 = vpop.f32.mrf.mxu1 }
  0xf6   : > { %v715_v14 = vpop.f32.mrf.mxu0 }
  0xf7   : > { %v716_v26 = vadd.f32 %v715_v14, %v633_v18 }
  0xf8   : > { %v4246_v20 = vpop.f32.mrf.mxu0 }
  0xfc   : > { %v790_v28 = vpop.f32.mrf.mxu1 }
  0xfd   : > { %v791_v29 = vadd.f32 %v790_v28, %v716_v26 }
  0xfe   : > { %v4257_v31 = vpop.f32.mrf.mxu1 }
  0xff   : > { %vm794_vm3 = vcmp.gt.f32.partialorder %v791_v29, 0.0 }
 0x100   : > { %v795_v37 = vsel %vm794_vm3, 1.0, %v4848_v36 }
 0x101   : > { %v993_v38 = vsub.f32 %v795_v37, %v795_v37  ;;  %4259 = vmatpush3.msra.mxu0 %v795_v37 }
 0x102   : > { %4261 = vmatmul.mubr.f32.vlgmr.msra.gmra.mxu0 %v916_v30  ;;  %4292 = vmatprep.subr.mxu0 %v4845_v1  ;;  %v824_v30 = vpop.permute.xlu0 %823 }
 0x103   : > { %4293 = vmatpush3.msra.mxu0 %v993_v38  ;;  %4263 = vmatprep.mubr.msk.f32.mxu0 %vm4846_vm1, %v4845_v1  ;;  %v994_v43 = vand.u32 4294901760, %v993_v38 }
 0x104   : > { %4326 = vmatprep.subr.mxu0 %v4845_v1 }
 0x105   : > { %v995_v44 = vsub.f32 %v993_v38, %v994_v43 }
 0x106   : > { %4264 = vmatmul.mubr.f32.gmra.mxu0 %v926_v39  ;;  %v809_v39 = vpop.permute.xlu0 %808 }
 0x107   : > { %4266 = vmatprep.mubr.msk.f32.mxu0 %vm4846_vm1, %v4845_v1  ;;  %v996_v48 = vand.u32 4294901760, %v995_v44 }
 0x109   : > { %4276 = vmatpush3.msra.mxu1 %v996_v48  ;;  %v3963_v48 = vld [vmem:[%s5867_s1 + $0x8] sm:$0xff] }
 0x10a   : > { %4267 = vmatmul.mubr.f32.gmra.mxu0 %v936_v45  ;;  %4278 = vmatmul.mubr.f32.vlgmr.msra.gmra.mxu1 %v5120_v61 }
 0x10b   : > { %4309 = vmatprep.subr.mxu1 %v4845_v1  ;;  %4269 = vmatprep.mubr.msk.f32.mxu0 %vm4846_vm1, %v4845_v1 }
 0x10c   : > { %4310 = vmatpush3.msra.mxu1 %v795_v37  ;;  %4280 = vmatprep.mubr.msk.f32.mxu1 %vm4846_vm1, %v4845_v1 }
 0x10d   : > { %4343 = vmatprep.subr.mxu1 %v4845_v1 }
 0x10e   : > { %4270 = vmatmul.mubr.f32.gmra.mxu0 %v946_v49  ;;  %4281 = vmatmul.mubr.f32.gmra.mxu1 %v5129_v4 }
 0x10f   : > { %4272 = vmatprep.mubr.msk.f32.mxu0 %vm4846_vm1, %v4845_v1  ;;  %4283 = vmatprep.mubr.msk.f32.mxu1 %vm4846_vm1, %v4845_v1 }
 0x112   : > { %4273 = vmatmul.mubr.f32.gmra.mxu0 %v956_v51  ;;  %4284 = vmatmul.mubr.f32.gmra.mxu1 %v5139_v17 }
 0x113   : > { %4286 = vmatprep.mubr.msk.f32.mxu1 %vm4846_vm1, %v4845_v1  ;;  %4294 = vmatprep.mubr.msk.f32.mxu0 %vm4846_vm1, %v4845_v1 }
 0x116   : > { %4287 = vmatmul.mubr.f32.gmra.mxu1 %v5152_v25  ;;  %4295 = vmatmul.mubr.f32.vlgmr.msra.gmra.mxu0 %v5127_v3 }
 0x117   : > { %4327 = vmatpush3.msra.mxu0 %v994_v43  ;;  %4289 = vmatprep.mubr.msk.f32.mxu1 %vm4846_vm1, %v4845_v1 }
 0x118   : > { %4297 = vmatprep.mubr.msk.f32.mxu0 %vm4846_vm1, %v4845_v1  ;;  %4360 = vmatprep.subr.mxu0 %v4845_v1 }
 0x11a   : > { %4290 = vmatmul.mubr.f32.gmra.mxu1 %v5162_v35  ;;  %4298 = vmatmul.mubr.f32.gmra.mxu0 %v5137_v16  ;;  %v814_v16 = vpop.permute.xlu1 %813 }
 0x11b   : > { %4300 = vmatprep.mubr.msk.f32.mxu0 %vm4846_vm1, %v4845_v1  ;;  %4311 = vmatprep.mubr.msk.f32.mxu1 %vm4846_vm1, %v4845_v1 }
 0x11e   : > { %4301 = vmatmul.mubr.f32.gmra.mxu0 %v5150_v24  ;;  %4312 = vmatmul.mubr.f32.vlgmr.msra.gmra.mxu1 %v914_v13 }
 0x11f   : > { %4344 = vmatpush3.msra.mxu1 %v795_v37  ;;  %4303 = vmatprep.mubr.msk.f32.mxu0 %vm4846_vm1, %v4845_v1 }
 0x120   : > { %4314 = vmatprep.mubr.msk.f32.mxu1 %vm4846_vm1, %v4845_v1  ;;  %4371 = vmatprep.subr.mxu1 %v4845_v1 }
 0x122   : > { %4304 = vmatmul.mubr.f32.gmra.mxu0 %v5160_v34  ;;  %4315 = vmatmul.mubr.f32.gmra.mxu1 %v924_v23  ;;  %v5263_v23 = vpop.permute.xlu1 %1473 }
 0x123   : > { %4306 = vmatprep.mubr.msk.f32.mxu0 %vm4846_vm1, %v4845_v1  ;;  %4317 = vmatprep.mubr.msk.f32.mxu1 %vm4846_vm1, %v4845_v1 }
 0x126   : > { %4307 = vmatmul.mubr.f32.gmra.mxu0 %v953_v42  ;;  %4318 = vmatmul.mubr.f32.gmra.mxu1 %v934_v33  ;;  %v5265_v31 = vpop.permute.xlu1 %1990 }
 0x127   : > { %4320 = vmatprep.mubr.msk.f32.mxu1 %vm4846_vm1, %v4845_v1  ;;  %4328 = vmatprep.mubr.msk.f32.mxu0 %vm4846_vm1, %v4845_v1 }
 0x12a   : > { %4321 = vmatmul.mubr.f32.gmra.mxu1 %v944_v41  ;;  %4329 = vmatmul.mubr.f32.vlgmr.msra.gmra.mxu0 %v5120_v61  ;;  %v5267_v40 = vpop.permute.xlu1 %1980 }
 0x12b   : > { %4323 = vmatprep.mubr.msk.f32.mxu1 %vm4846_vm1, %v4845_v1  ;;  %4331 = vmatprep.mubr.msk.f32.mxu0 %vm4846_vm1, %v4845_v1 }
 0x12e   : > { %4324 = vmatmul.mubr.f32.gmra.mxu1 %v954_v47  ;;  %4332 = vmatmul.mubr.f32.gmra.mxu0 %v5129_v4 }
 0x12f   : > { %4334 = vmatprep.mubr.msk.f32.mxu0 %vm4846_vm1, %v4845_v1  ;;  %4345 = vmatprep.mubr.msk.f32.mxu1 %vm4846_vm1, %v4845_v1 }
 0x132   : > { %4335 = vmatmul.mubr.f32.gmra.mxu0 %v5139_v17  ;;  %4346 = vmatmul.mubr.f32.vlgmr.msra.gmra.mxu1 %v5120_v61 }
 0x133   : > { %4337 = vmatprep.mubr.msk.f32.mxu0 %vm4846_vm1, %v4845_v1  ;;  %4348 = vmatprep.mubr.msk.f32.mxu1 %vm4846_vm1, %v4845_v1 }
 0x136   : > { %4338 = vmatmul.mubr.f32.gmra.mxu0 %v5152_v25  ;;  %4349 = vmatmul.mubr.f32.gmra.mxu1 %v5129_v4 }
 0x137   : > { %4340 = vmatprep.mubr.msk.f32.mxu0 %vm4846_vm1, %v4845_v1  ;;  %4351 = vmatprep.mubr.msk.f32.mxu1 %vm4846_vm1, %v4845_v1 }
 0x13a   : > { %4341 = vmatmul.mubr.f32.gmra.mxu0 %v5162_v35  ;;  %4352 = vmatmul.mubr.f32.gmra.mxu1 %v5139_v17 }
 0x13b   : > { %4354 = vmatprep.mubr.msk.f32.mxu1 %vm4846_vm1, %v4845_v1  ;;  %4368 = vmatprep.mubr.msk.f32.mxu0 %vm4846_vm1, %v4845_v1 }
 0x13e   : > { %4355 = vmatmul.mubr.f32.gmra.mxu1 %v5152_v25 }
 0x13f   : > { %4357 = vmatprep.mubr.msk.f32.mxu1 %vm4846_vm1, %v4845_v1 }
 0x142   : > { %4358 = vmatmul.mubr.f32.gmra.mxu1 %v5162_v35 }
 0x143   : > { %4379 = vmatprep.mubr.msk.f32.mxu1 %vm4846_vm1, %v4845_v1 }
 0x1c2   : > { %v918_v52 = vpop.f32.mrf.mxu0 }
 0x1c3   : > { %v919_v43 = vadd.f32 %v918_v52, %v809_v39 }
 0x1c4   : > { %v4262_v53 = vpop.f32.mrf.mxu0 }
 0x1c6   : > { %v928_v54 = vpop.f32.mrf.mxu0 }
 0x1c7   : > { %v929_v36 = vadd.f32 %v928_v54, %v814_v16 }
 0x1c8   : > { %v4265_v55 = vpop.f32.mrf.mxu0 }
 0x1ca   : > { %v938_v56 = vpop.f32.mrf.mxu0  ;;  %v1033_v57 = vpop.f32.mrf.mxu1 }
 0x1cb   : > { %v939_v44 = vadd.f32 %v938_v56, %v819_v5  ;;  %v1034_v49 = vadd.f32 %v1033_v57, %v919_v43 }
 0x1cc   : > { %v4268_v58 = vpop.f32.mrf.mxu0  ;;  %v4279_v59 = vpop.f32.mrf.mxu1 }
 0x1cd   : > { %v829_v58 = vpop.permute.xlu1 %828 }
 0x1ce   : > { %v948_v60 = vpop.f32.mrf.mxu0  ;;  %v1039_v61 = vpop.f32.mrf.mxu1 }
 0x1cf   : > { %v1040_v45 = vadd.f32 %v1039_v61, %v929_v36  ;;  %v949_v56 = vadd.f32 %v948_v60, %v824_v30 }
 0x1d0   : > { %v4271_v62 = vpop.f32.mrf.mxu0  ;;  %v4282_v63 = vpop.f32.mrf.mxu1 }
 0x1d1   : > { %v1477_v62 = vsel %vm305_vm0, %v3963_v48, 0 }
 0x1d2   : > { %v958_v0 = vpop.f32.mrf.mxu0  ;;  %v1045_v2 = vpop.f32.mrf.mxu1 }
 0x1d3   : > { %v1046_v54 = vadd.f32 %v1045_v2, %v939_v44  ;;  %v959_v5 = vadd.f32 %v958_v0, %v829_v58 }
 0x1d4   : > { %v4274_v3 = vpop.f32.mrf.mxu0  ;;  %v4285_v4 = vpop.f32.mrf.mxu1 }
 0x1d6   : > { %v1051_v6 = vpop.f32.mrf.mxu1  ;;  %v1130_v7 = vpop.f32.mrf.mxu0 }
 0x1d7   : > { %v1131_v55 = vadd.f32 %v1130_v7, %v1034_v49  ;;  %v1052_v16 = vadd.f32 %v1051_v6, %v949_v56 }
 0x1d8   : > { %v4288_v11 = vpop.f32.mrf.mxu1  ;;  %v4296_v12 = vpop.f32.mrf.mxu0 }
 0x1da   : > { %v5261_v13 = vpop.f32.mrf.mxu1  ;;  %v1137_v14 = vpop.f32.mrf.mxu0 }
 0x1db   : > { %v1138_v50 = vadd.f32 %v1137_v14, %v1040_v45  ;;  %v1058_v60 = vadd.f32 %v5261_v13, %v959_v5 }
 0x1dc   : > { %v4291_v17 = vpop.f32.mrf.mxu1  ;;  %v4299_v18 = vpop.f32.mrf.mxu0 }
 0x1dd   : > { %v5273_v18 = vand.u32 4294901760, %v1477_v62 }
 0x1de   : > { %v1144_v19 = vpop.f32.mrf.mxu0  ;;  %v1231_v20 = vpop.f32.mrf.mxu1 }
 0x1df   : > { %v1145_v61 = vadd.f32 %v1144_v19, %v1046_v54  ;;  %v1232_v3 = vadd.f32 %v1231_v20, %v1131_v55  ;;  %v5280_v6 = vsub.f32 %v1477_v62, %v5273_v18 }
 0x1e0   : > { %v4302_v21 = vpop.f32.mrf.mxu0  ;;  %v4313_v22 = vpop.f32.mrf.mxu1 }
 0x1e1   : > { %v1550_v39 = vand.u32 4294901760, %v5280_v6 }
 0x1e2   : > { %v1151_v24 = vpop.f32.mrf.mxu0  ;;  %v1239_v25 = vpop.f32.mrf.mxu1 }
 0x1e3   : > { %v1240_v59 = vadd.f32 %v1239_v25, %v1138_v50  ;;  %v1152_v21 = vadd.f32 %v1151_v24, %v1052_v16 }
 0x1e4   : > { %v4305_v26 = vpop.f32.mrf.mxu0  ;;  %v4316_v27 = vpop.f32.mrf.mxu1 }
 0x1e6   : > { %v1158_v28 = vpop.f32.mrf.mxu0  ;;  %v1247_v29 = vpop.f32.mrf.mxu1 }
 0x1e7   : > { %v1248_v57 = vadd.f32 %v1247_v29, %v1145_v61 }
 0x1e8   : > { %v4308_v32 = vpop.f32.mrf.mxu0  ;;  %v4319_v33 = vpop.f32.mrf.mxu1 }
 0x1e9   : > { %v1159_v32 = vadd.f32 %v1158_v28, %v1058_v60 }
 0x1ea   : > { %v1255_v34 = vpop.f32.mrf.mxu1  ;;  %v1336_v35 = vpop.f32.mrf.mxu0 }
 0x1eb   : > { %v1337_v14 = vadd.f32 %v1336_v35, %v1232_v3  ;;  %v1256_v19 = vadd.f32 %v1255_v34, %v1152_v21 }
 0x1ec   : > { %v4322_v37 = vpop.f32.mrf.mxu1  ;;  %v4330_v38 = vpop.f32.mrf.mxu0 }
 0x1ee   : > { %v1263_v41 = vpop.f32.mrf.mxu1  ;;  %v1342_v42 = vpop.f32.mrf.mxu0 }
 0x1ef   : > { %v1343_v4 = vadd.f32 %v1342_v42, %v1240_v59  ;;  %v1264_v13 = vadd.f32 %v1263_v41, %v1159_v32 }
 0x1f0   : > { %v4325_v46 = vpop.f32.mrf.mxu1  ;;  %v4333_v47 = vpop.f32.mrf.mxu0 }
 0x1f1   : > { %v1551_v46 = vsub.f32 %v5280_v6, %v1550_v39 }
 0x1f2   : > { %v1348_v51 = vpop.f32.mrf.mxu0  ;;  %v1431_v53 = vpop.f32.mrf.mxu1 }
 0x1f3   : > { %v1349_v22 = vadd.f32 %v1348_v51, %v1248_v57  ;;  %v1432_v25 = vadd.f32 %v1431_v53, %v1337_v14  ;;  %v1552_v55 = vand.u32 4294901760, %v1551_v46  ;;  %v3965_v57 = vld [vmem:[%s5869_s3 + $0x28] sm:$0xff] }
 0x1f4   : > { %v4336_v63 = vpop.f32.mrf.mxu0  ;;  %v4347_v52 = vpop.f32.mrf.mxu1 }
 0x1f5   : > { %v5283_v33 = vsub.f32 %v4995_v15, %v1432_v25 }
 0x1f6   : > { %v1354_v11 = vpop.f32.mrf.mxu0  ;;  %v1437_v12 = vpop.f32.mrf.mxu1 }
 0x1f7   : > { %v1438_v17 = vadd.f32 %v1437_v12, %v1343_v4  ;;  %v1355_v24 = vadd.f32 %v1354_v11, %v1256_v19  ;;  %v5296_v28 = vand.u32 4294901760, %v5283_v33 }
 0x1f8   : > { %v4339_v2 = vpop.f32.mrf.mxu0  ;;  %v4350_v7 = vpop.f32.mrf.mxu1 }
 0x1f9   : > { %v5277_v0 = vsub.f32 %v4982_v10, %v1438_v17  ;;  %v5317_v48 = vsub.f32 %v5283_v33, %v5296_v28  ;;  %v2004_v17 = vsel %vm831_vm2, %v3965_v57, 0 }
 0x1fa   : > { %v1360_v26 = vpop.f32.mrf.mxu0  ;;  %v1443_v27 = vpop.f32.mrf.mxu1  ;;  %v5398_v21 = vand.u32 4294901760, %v2004_v17 }
 0x1fb   : > { %v1444_v20 = vadd.f32 %v1443_v27, %v1349_v22  ;;  %v5289_v34 = vand.u32 4294901760, %v5277_v0  ;;  %v1361_v15 = vadd.f32 %v1360_v26, %v1264_v13  ;;  %v1606_v63 = vand.u32 4294901760, %v5317_v48  ;;  %v3967_v27 = vld [vmem:[%s5869_s3 + $0x38] sm:$0xff] }
 0x1fc   : > { %v4353_v29 = vpop.f32.mrf.mxu1  ;;  %v4342_v30 = vpop.f32.mrf.mxu0  ;;  %v5406_v19 = vsub.f32 %v2004_v17, %v5398_v21 }
 0x1fd   : > { %v5286_v35 = vsub.f32 %v4979_v9, %v1444_v20  ;;  %v5307_v43 = vsub.f32 %v5277_v0, %v5289_v34  ;;  %v1607_v4 = vsub.f32 %v5317_v48, %v1606_v63  ;;  %v3968_v30 = vld [vmem:[%s5869_s3 + $0x40] sm:$0xff] }
 0x1fe   : > { %v1449_v36 = vpop.f32.mrf.mxu1  ;;  %v2085_v32 = vand.u32 4294901760, %v5406_v19 }
 0x1ff   : > { %v5292_v10 = vand.u32 4294901760, %v5286_v35  ;;  %v1450_v37 = vadd.f32 %v1449_v36, %v1355_v24  ;;  %v1599_v54 = vand.u32 4294901760, %v5307_v43  ;;  %v1608_v11 = vand.u32 4294901760, %v1607_v4 }
 0x200   : > { %v4356_v38 = vpop.f32.mrf.mxu1 }
 0x201   : > { %v5300_v9 = vsub.f32 %v5286_v35, %v5292_v10  ;;  %v5303_v41 = vsub.f32 %v4976_v8, %v1450_v37  ;;  %v1600_v61 = vsub.f32 %v5307_v43, %v1599_v54  ;;  %v2013_v37 = vsel %vm831_vm2, %v3968_v30, 0 }
 0x202   : > { %v1455_v42 = vpop.f32.mrf.mxu1 }
 0x203   : > { %v5310_v44 = vand.u32 4294901760, %v5303_v41  ;;  %v1456_v45 = vadd.f32 %v1455_v42, %v1361_v15  ;;  %v1592_v50 = vand.u32 4294901760, %v5300_v9  ;;  %v1601_v5 = vand.u32 4294901760, %v1600_v61 }
 0x204   : > { %v4359_v47 = vpop.f32.mrf.mxu1  ;;  %v5431_v42 = vand.u32 4294901760, %v2013_v37 }
 0x205   : > { %v1584_v8 = vsub.f32 %v5303_v41, %v5310_v44  ;;  %v1463_v49 = vmul.f32 0.5, %v1456_v45  ;;  %4361 = vmatpush3.msra.mxu0 %v5310_v44  ;;  %v1593_v62 = vsub.f32 %v5300_v9, %v1592_v50 }
 0x206   : > { %4362 = vmatprep.subr.mxu0 %v4845_v1 }
 0x207   : > { %v1464_v51 = vadd.f32 127.5, %v1463_v49  ;;  %4363 = vmatpush3.msra.mxu0 %v5292_v10  ;;  %v1585_v53 = vand.u32 4294901760, %v1584_v8  ;;  %v1594_v3 = vand.u32 4294901760, %v1593_v62 }
 0x208   : > { %4364 = vmatprep.subr.mxu0 %v4845_v1 }
 0x209   : > { %v4696_v58 = vtrunc.f32 %v1464_v51  ;;  %4365 = vmatpush3.msra.mxu0 %v5289_v34  ;;  %v1586_v59 = vsub.f32 %v1584_v8, %v1585_v53 }
 0x20a   : > { %4366 = vmatprep.subr.mxu0 %v4845_v1 }
 0x20b   : > { %v4697_v52 = vcvt.f32.s32 %v4696_v58  ;;  %4367 = vmatpush3.msra.mxu0 %v5296_v28  ;;  %v1587_v56 = vand.u32 4294901760, %v1586_v59 }
 0x20c   : > { %4369 = vmatmul.mubr.f32.vlgmr.msra.gmra.mxu0 %v1552_v55  ;;  %4382 = vmatprep.subr.mxu0 %v4845_v1 }
 0x20d   : > { %1466 = vst [vmem:[%s5334_s15] sm:$0x1] %v4697_v52  ;;  %4372 = vmatpush3.msra.mxu1 %v1587_v56  ;;  %4383 = vmatpush3.msra.mxu0 %v1584_v8 }
 0x20e   : > { %4373 = vmatprep.subr.mxu1 %v4845_v1  ;;  %4384 = vmatprep.subr.mxu0 %v4845_v1 }
 0x20f   : > { %4374 = vmatpush3.msra.mxu1 %v1594_v3  ;;  %4385 = vmatpush3.msra.mxu0 %v5300_v9 }
 0x210   : > { %4375 = vmatprep.subr.mxu1 %v4845_v1  ;;  %4386 = vmatprep.subr.mxu0 %v4845_v1 }
 0x211   : > { %4376 = vmatpush3.msra.mxu1 %v1601_v5  ;;  %4387 = vmatpush3.msra.mxu0 %v5307_v43 }
 0x212   : > { %4377 = vmatprep.subr.mxu1 %v4845_v1  ;;  %4388 = vmatprep.subr.mxu0 %v4845_v1 }
 0x213   : > { %4378 = vmatpush3.msra.mxu1 %v1608_v11  ;;  %4389 = vmatpush3.msra.mxu0 %v5317_v48 }
 0x214   : > { %4380 = vmatmul.mubr.f32.vlgmr.msra.gmra.mxu1 %v5273_v18  ;;  %4390 = vmatprep.mubr.msk.f32.mxu0 %vm4846_vm1, %v4845_v1 }
 0x215   : > { %4393 = vmatprep.subr.mxu1 %v4845_v1  ;;  %4404 = vmatprep.subr.mxu0 %v4845_v1 }
 0x216   : > { %4391 = vmatmul.mubr.f32.vlgmr.msra.gmra.mxu0 %v5280_v6  ;;  %4394 = vmatpush3.msra.mxu1 %v5310_v44  ;;  %v2010_v6 = vsel %vm831_vm2, %v3967_v27, 0 }
 0x217   : > { %4405 = vmatpush3.msra.mxu0 %v1585_v53  ;;  %4395 = vmatprep.subr.mxu1 %v4845_v1  ;;  %v4849_v53 = vmov -0.5  }
 0x218   : > { %4406 = vmatprep.subr.mxu0 %v4845_v1  ;;  %4396 = vmatpush3.msra.mxu1 %v5292_v10 }
 0x219   : > { %4407 = vmatpush3.msra.mxu0 %v1592_v50  ;;  %4397 = vmatprep.subr.mxu1 %v4845_v1  ;;  %v5439_v50 = vsub.f32 %v2013_v37, %v5431_v42 }
 0x21a   : > { %4408 = vmatprep.subr.mxu0 %v4845_v1  ;;  %4398 = vmatpush3.msra.mxu1 %v5289_v34 }
 0x21b   : > { %4409 = vmatpush3.msra.mxu0 %v1599_v54  ;;  %4399 = vmatprep.subr.mxu1 %v4845_v1  ;;  %v2115_v62 = vand.u32 4294901760, %v5439_v50 }
 0x21c   : > { %4410 = vmatprep.subr.mxu0 %v4845_v1  ;;  %4400 = vmatpush3.msra.mxu1 %v5296_v28 }
 0x21d   : > { %4401 = vmatprep.mubr.msk.f32.mxu1 %vm4846_vm1, %v4845_v1  ;;  %4411 = vmatpush3.msra.mxu0 %v1606_v63  ;;  %v2116_v3 = vsub.f32 %v5439_v50, %v2115_v62 }
 0x21e   : > { %4402 = vmatmul.mubr.f32.vlgmr.msra.gmra.mxu1 %v1550_v39  ;;  %4415 = vmatprep.subr.mxu1 %v4845_v1  ;;  %v3969_v39 = vld [vmem:[%s5869_s3 + $0x48] sm:$0x1] }
 0x21f   : > { %4412 = vmatprep.mubr.msk.f32.mxu0 %vm4846_vm1, %v4845_v1  ;;  %4416 = vmatpush3.msra.mxu1 %v5310_v44  ;;  %v2016_v44 = vsel %vm831_vm2, %v3969_v39, 0  ;;  %v2117_v11 = vand.u32 4294901760, %v2116_v3 }
 0x220   : > { %4413 = vmatmul.mubr.f32.vlgmr.msra.gmra.mxu0 %v5273_v18  ;;  %4417 = vmatprep.subr.mxu1 %v4845_v1  ;;  %v5441_v51 = vand.u32 4294901760, %v2016_v44 }
 0x221   : > { %4418 = vmatpush3.msra.mxu1 %v5292_v10  ;;  %4423 = vmatprep.mubr.msk.f32.mxu1 %vm4846_vm1, %v4845_v1 }
 0x222   : > { %4419 = vmatprep.subr.mxu1 %v4845_v1  ;;  %4426 = vmatprep.subr.mxu0 %v4845_v1  ;;  %v2124_v63 = vsub.f32 %v2016_v44, %v5441_v51  ;;  %v1996_v44 = vpop.permute.xlu0 %1995 }
 0x223   : > { %4420 = vmatpush3.msra.mxu1 %v5289_v34  ;;  %4428 = vmatprep.mubr.msk.f32.mxu0 %vm4846_vm1, %v4845_v1  ;;  %v5418_v34 = vand.u32 4294901760, %v2010_v6 }
 0x224   : > { %4421 = vmatprep.subr.mxu1 %v4845_v1  ;;  %v2125_v4 = vand.u32 4294901760, %v2124_v63 }
 0x225   : > { %4422 = vmatpush3.msra.mxu1 %v5296_v28  ;;  %v2086_v28 = vsub.f32 %v5406_v19, %v2085_v32  ;;  %v5429_v9 = vsub.f32 %v2010_v6, %v5418_v34 }
 0x226   : > { %4424 = vmatmul.mubr.f32.vlgmr.msra.gmra.mxu1 %v5273_v18  ;;  %4443 = vmatprep.subr.mxu1 %v4845_v1  ;;  %v3966_v18 = vld [vmem:[%s5869_s3 + $0x30] sm:$0xff] }
 0x227   : > { %4445 = vmatprep.mubr.msk.f32.mxu1 %vm4846_vm1, %v4845_v1  ;;  %v2007_v26 = vsel %vm831_vm2, %v3966_v18, 0  ;;  %v2087_v47 = vand.u32 4294901760, %v2086_v28  ;;  %v2105_v49 = vand.u32 4294901760, %v5429_v9 }
 0x228   : > { %v5408_v20 = vand.u32 4294901760, %v2007_v26 }
 0x229   : > { %v2106_v59 = vsub.f32 %v5429_v9, %v2105_v49 }
 0x22a   : > { %v5416_v13 = vsub.f32 %v2007_v26, %v5408_v20 }
 0x22b   : > { %v2107_v61 = vand.u32 4294901760, %v2106_v59 }
 0x22c   : > { %v2095_v15 = vand.u32 4294901760, %v5416_v13 }
 0x22e   : > { %v2096_v8 = vsub.f32 %v5416_v13, %v2095_v15 }
 0x230   : > { %v2097_v58 = vand.u32 4294901760, %v2096_v8 }
 0x2cc   : > { %v1554_v12 = vpop.f32.mrf.mxu0 }
 0x2cd   : > { %v1555_v25 = vadd.f32 %v1554_v12, %v5263_v23  ;;  %v2126_v12 = vsub.f32 %v2124_v63, %v2125_v4 }
 0x2ce   : > { %v4370_v16 = vpop.f32.mrf.mxu0 }
 0x2cf   : > { %v2127_v16 = vand.u32 4294901760, %v2126_v12 }
 0x2d4   : > { %v1645_v14 = vpop.f32.mrf.mxu1 }
 0x2d5   : > { %v1646_v60 = vadd.f32 %v1645_v14, %v1555_v25 }
 0x2d6   : > { %v4381_v2 = vpop.f32.mrf.mxu1  ;;  %v1725_v7 = vpop.f32.mrf.mxu0 }
 0x2d7   : > { %v1726_v23 = vadd.f32 %v1725_v7, %v1646_v60 }
 0x2d8   : > { %v4392_v22 = vpop.f32.mrf.mxu0 }
 0x2de   : > { %v1802_v29 = vpop.f32.mrf.mxu1 }
 0x2df   : > { %v1803_v10 = vadd.f32 %v1802_v29, %v1726_v23 }
 0x2e0   : > { %v4403_v24 = vpop.f32.mrf.mxu1  ;;  %v1885_v36 = vpop.f32.mrf.mxu0 }
 0x2e1   : > { %v1886_v43 = vadd.f32 %v1885_v36, %v1803_v10 }
 0x2e2   : > { %v4414_v38 = vpop.f32.mrf.mxu0 }
 0x2e6   : > { %v1960_v45 = vpop.f32.mrf.mxu1 }
 0x2e7   : > { %v1961_v46 = vadd.f32 %v1960_v45, %v1886_v43 }
 0x2e8   : > { %v4425_v48 = vpop.f32.mrf.mxu1 }
 0x2e9   : > { %vm1964_vm4 = vcmp.gt.f32.partialorder %v1961_v46, 0.0 }
 0x2ea   : > { %v1965_v54 = vsel %vm1964_vm4, 0.5, %v4849_v53 }
 0x2eb   : > { %v2164_v55 = vsub.f32 %v1965_v54, %v1965_v54  ;;  %4427 = vmatpush3.msra.mxu0 %v1965_v54 }
 0x2ec   : > { %4429 = vmatmul.mubr.f32.vlgmr.msra.gmra.mxu0 %v2087_v47  ;;  %4460 = vmatprep.subr.mxu0 %v4845_v1 }
 0x2ed   : > { %4461 = vmatpush3.msra.mxu0 %v2164_v55  ;;  %4431 = vmatprep.mubr.msk.f32.mxu0 %vm4846_vm1, %v4845_v1  ;;  %v2165_v52 = vand.u32 4294901760, %v2164_v55 }
 0x2ee   : > { %4494 = vmatprep.subr.mxu0 %v4845_v1 }
 0x2ef   : > { %v2166_v56 = vsub.f32 %v2164_v55, %v2165_v52 }
 0x2f0   : > { %4432 = vmatmul.mubr.f32.gmra.mxu0 %v2097_v58 }
 0x2f1   : > { %4434 = vmatprep.mubr.msk.f32.mxu0 %vm4846_vm1, %v4845_v1  ;;  %v2167_v5 = vand.u32 4294901760, %v2166_v56  ;;  %v3975_v56 = vld [vmem:[%s5867_s1 + $0x10] sm:$0xff] }
 0x2f3   : > { %4444 = vmatpush3.msra.mxu1 %v2167_v5 }
 0x2f4   : > { %4435 = vmatmul.mubr.f32.gmra.mxu0 %v2107_v61  ;;  %4446 = vmatmul.mubr.f32.vlgmr.msra.gmra.mxu1 %v5398_v21 }
 0x2f5   : > { %4477 = vmatprep.subr.mxu1 %v4845_v1  ;;  %4437 = vmatprep.mubr.msk.f32.mxu0 %vm4846_vm1, %v4845_v1 }
 0x2f6   : > { %4478 = vmatpush3.msra.mxu1 %v1965_v54  ;;  %4448 = vmatprep.mubr.msk.f32.mxu1 %vm4846_vm1, %v4845_v1 }
 0x2f7   : > { %4511 = vmatprep.subr.mxu1 %v4845_v1 }
 0x2f8   : > { %4438 = vmatmul.mubr.f32.gmra.mxu0 %v2117_v11  ;;  %4449 = vmatmul.mubr.f32.gmra.mxu1 %v5408_v20 }
 0x2f9   : > { %4440 = vmatprep.mubr.msk.f32.mxu0 %vm4846_vm1, %v4845_v1  ;;  %4451 = vmatprep.mubr.msk.f32.mxu1 %vm4846_vm1, %v4845_v1 }
 0x2fc   : > { %4441 = vmatmul.mubr.f32.gmra.mxu0 %v2127_v16  ;;  %4452 = vmatmul.mubr.f32.gmra.mxu1 %v5418_v34 }
 0x2fd   : > { %4454 = vmatprep.mubr.msk.f32.mxu1 %vm4846_vm1, %v4845_v1  ;;  %4462 = vmatprep.mubr.msk.f32.mxu0 %vm4846_vm1, %v4845_v1 }
 0x300   : > { %4455 = vmatmul.mubr.f32.gmra.mxu1 %v5431_v42  ;;  %4463 = vmatmul.mubr.f32.vlgmr.msra.gmra.mxu0 %v5406_v19 }
 0x301   : > { %4495 = vmatpush3.msra.mxu0 %v2165_v52  ;;  %4457 = vmatprep.mubr.msk.f32.mxu1 %vm4846_vm1, %v4845_v1 }
 0x302   : > { %4465 = vmatprep.mubr.msk.f32.mxu0 %vm4846_vm1, %v4845_v1  ;;  %4528 = vmatprep.subr.mxu0 %v4845_v1 }
 0x304   : > { %4458 = vmatmul.mubr.f32.gmra.mxu1 %v5441_v51  ;;  %4466 = vmatmul.mubr.f32.gmra.mxu0 %v5416_v13 }
 0x305   : > { %4468 = vmatprep.mubr.msk.f32.mxu0 %vm4846_vm1, %v4845_v1  ;;  %4479 = vmatprep.mubr.msk.f32.mxu1 %vm4846_vm1, %v4845_v1 }
 0x308   : > { %4469 = vmatmul.mubr.f32.gmra.mxu0 %v5429_v9  ;;  %4480 = vmatmul.mubr.f32.vlgmr.msra.gmra.mxu1 %v2085_v32 }
 0x309   : > { %4512 = vmatpush3.msra.mxu1 %v1965_v54  ;;  %4471 = vmatprep.mubr.msk.f32.mxu0 %vm4846_vm1, %v4845_v1 }
 0x30a   : > { %4482 = vmatprep.mubr.msk.f32.mxu1 %vm4846_vm1, %v4845_v1  ;;  %4539 = vmatprep.subr.mxu1 %v4845_v1 }
 0x30c   : > { %4472 = vmatmul.mubr.f32.gmra.mxu0 %v5439_v50  ;;  %4483 = vmatmul.mubr.f32.gmra.mxu1 %v2095_v15  ;;  %v1986_v50 = vpop.permute.xlu0 %1985 }
 0x30d   : > { %4474 = vmatprep.mubr.msk.f32.mxu0 %vm4846_vm1, %v4845_v1  ;;  %4485 = vmatprep.mubr.msk.f32.mxu1 %vm4846_vm1, %v4845_v1 }
 0x310   : > { %4475 = vmatmul.mubr.f32.gmra.mxu0 %v2124_v63  ;;  %4486 = vmatmul.mubr.f32.gmra.mxu1 %v2105_v49 }
 0x311   : > { %4488 = vmatprep.mubr.msk.f32.mxu1 %vm4846_vm1, %v4845_v1  ;;  %4496 = vmatprep.mubr.msk.f32.mxu0 %vm4846_vm1, %v4845_v1 }
 0x314   : > { %4489 = vmatmul.mubr.f32.gmra.mxu1 %v2115_v62  ;;  %4497 = vmatmul.mubr.f32.vlgmr.msra.gmra.mxu0 %v5398_v21 }
 0x315   : > { %4491 = vmatprep.mubr.msk.f32.mxu1 %vm4846_vm1, %v4845_v1  ;;  %4499 = vmatprep.mubr.msk.f32.mxu0 %vm4846_vm1, %v4845_v1 }
 0x318   : > { %4492 = vmatmul.mubr.f32.gmra.mxu1 %v2125_v4  ;;  %4500 = vmatmul.mubr.f32.gmra.mxu0 %v5408_v20 }
 0x319   : > { %4502 = vmatprep.mubr.msk.f32.mxu0 %vm4846_vm1, %v4845_v1  ;;  %4513 = vmatprep.mubr.msk.f32.mxu1 %vm4846_vm1, %v4845_v1 }
 0x31c   : > { %4503 = vmatmul.mubr.f32.gmra.mxu0 %v5418_v34  ;;  %4514 = vmatmul.mubr.f32.vlgmr.msra.gmra.mxu1 %v5398_v21 }
 0x31d   : > { %4505 = vmatprep.mubr.msk.f32.mxu0 %vm4846_vm1, %v4845_v1  ;;  %4516 = vmatprep.mubr.msk.f32.mxu1 %vm4846_vm1, %v4845_v1 }
 0x320   : > { %4506 = vmatmul.mubr.f32.gmra.mxu0 %v5431_v42  ;;  %4517 = vmatmul.mubr.f32.gmra.mxu1 %v5408_v20 }
 0x321   : > { %4508 = vmatprep.mubr.msk.f32.mxu0 %vm4846_vm1, %v4845_v1  ;;  %4519 = vmatprep.mubr.msk.f32.mxu1 %vm4846_vm1, %v4845_v1 }
 0x324   : > { %4509 = vmatmul.mubr.f32.gmra.mxu0 %v5441_v51  ;;  %4520 = vmatmul.mubr.f32.gmra.mxu1 %v5418_v34 }
 0x325   : > { %4522 = vmatprep.mubr.msk.f32.mxu1 %vm4846_vm1, %v4845_v1  ;;  %4536 = vmatprep.mubr.msk.f32.mxu0 %vm4846_vm1, %v4845_v1 }
 0x328   : > { %4523 = vmatmul.mubr.f32.gmra.mxu1 %v5431_v42 }
 0x329   : > { %4525 = vmatprep.mubr.msk.f32.mxu1 %vm4846_vm1, %v4845_v1 }
 0x32c   : > { %4526 = vmatmul.mubr.f32.gmra.mxu1 %v5441_v51 }
 0x32d   : > { %4547 = vmatprep.mubr.msk.f32.mxu1 %vm4846_vm1, %v4845_v1 }
 0x3ac   : > { %v2089_v57 = vpop.f32.mrf.mxu0 }
 0x3ad   : > { %v2090_v59 = vadd.f32 %v2089_v57, %v5267_v40 }
 0x3ae   : > { %v4430_v14 = vpop.f32.mrf.mxu0 }
 0x3b0   : > { %v2099_v17 = vpop.f32.mrf.mxu0 }
 0x3b1   : > { %v2100_v54 = vadd.f32 %v2099_v17, %v1986_v50  ;;  %v2647_v17 = vsel %vm305_vm0, %v3975_v56, 0 }
 0x3b2   : > { %v4433_v2 = vpop.f32.mrf.mxu0 }
 0x3b4   : > { %v2109_v7 = vpop.f32.mrf.mxu0  ;;  %v2204_v18 = vpop.f32.mrf.mxu1 }
 0x3b5   : > { %v2110_v61 = vadd.f32 %v2109_v7, %v5265_v31  ;;  %v2205_v3 = vadd.f32 %v2204_v18, %v2090_v59 }
 0x3b6   : > { %v4436_v21 = vpop.f32.mrf.mxu0  ;;  %v4447_v22 = vpop.f32.mrf.mxu1 }
 0x3b8   : > { %v2119_v25 = vpop.f32.mrf.mxu0  ;;  %v2210_v26 = vpop.f32.mrf.mxu1 }
 0x3b9   : > { %v2211_v62 = vadd.f32 %v2210_v26, %v2100_v54  ;;  %v2120_v57 = vadd.f32 %v2119_v25, %v1996_v44 }
 0x3ba   : > { %v4439_v27 = vpop.f32.mrf.mxu0  ;;  %v4450_v60 = vpop.f32.mrf.mxu1 }
 0x3bc   : > { %v5540_v19 = vpop.f32.mrf.mxu0  ;;  %v2216_v20 = vpop.f32.mrf.mxu1 }
 0x3bd   : > { %v2217_v12 = vadd.f32 %v2216_v20, %v2110_v61 }
 0x3be   : > { %v4442_v6 = vpop.f32.mrf.mxu0  ;;  %v4453_v29 = vpop.f32.mrf.mxu1 }
 0x3bf   : > { %v2001_v6 = vpop.permute.xlu1 %2000 }
 0x3c0   : > { %v2222_v30 = vpop.f32.mrf.mxu1  ;;  %v2301_v23 = vpop.f32.mrf.mxu0 }
 0x3c1   : > { %v2302_v16 = vadd.f32 %v2301_v23, %v2205_v3  ;;  %v2223_v29 = vadd.f32 %v2222_v30, %v2120_v57 }
 0x3c2   : > { %v4456_v32 = vpop.f32.mrf.mxu1  ;;  %v4464_v24 = vpop.f32.mrf.mxu0 }
 0x3c3   : > { %v5548_v32 = vand.u32 4294901760, %v2647_v17  ;;  %v2130_v24 = vadd.f32 %v5540_v19, %v2001_v6 }
 0x3c4   : > { %v2228_v36 = vpop.f32.mrf.mxu1  ;;  %v2308_v13 = vpop.f32.mrf.mxu0 }
 0x3c5   : > { %v2309_v4 = vadd.f32 %v2308_v13, %v2211_v62 }
 0x3c6   : > { %v4459_v34 = vpop.f32.mrf.mxu1  ;;  %v4467_v10 = vpop.f32.mrf.mxu0 }
 0x3c8   : > { %v2315_v37 = vpop.f32.mrf.mxu0  ;;  %v2402_v38 = vpop.f32.mrf.mxu1 }
 0x3c9   : > { %v2316_v21 = vadd.f32 %v2315_v37, %v2217_v12  ;;  %v2403_v22 = vadd.f32 %v2402_v38, %v2302_v16  ;;  %v2229_v38 = vadd.f32 %v2228_v36, %v2130_v24 }
 0x3ca   : > { %v4470_v39 = vpop.f32.mrf.mxu0  ;;  %v4481_v28 = vpop.f32.mrf.mxu1 }
 0x3cc   : > { %v2322_v15 = vpop.f32.mrf.mxu0  ;;  %v2410_v9 = vpop.f32.mrf.mxu1 }
 0x3cd   : > { %v2411_v14 = vadd.f32 %v2410_v9, %v2309_v4  ;;  %v2323_v13 = vadd.f32 %v2322_v15, %v2223_v29  ;;  %v5555_v9 = vsub.f32 %v2647_v17, %v5548_v32 }
 0x3ce   : > { %v4473_v42 = vpop.f32.mrf.mxu0  ;;  %v4484_v43 = vpop.f32.mrf.mxu1 }
 0x3cf   : > { %v2720_v50 = vand.u32 4294901760, %v5555_v9 }
 0x3d0   : > { %v2329_v45 = vpop.f32.mrf.mxu0  ;;  %v2418_v46 = vpop.f32.mrf.mxu1 }
 0x3d1   : > { %v2419_v31 = vadd.f32 %v2418_v46, %v2316_v21  ;;  %v2330_v44 = vadd.f32 %v2329_v45, %v2229_v38  ;;  %v2721_v59 = vsub.f32 %v5555_v9, %v2720_v50 }
 0x3d2   : > { %v4476_v47 = vpop.f32.mrf.mxu0  ;;  %v4487_v48 = vpop.f32.mrf.mxu1 }
 0x3d4   : > { %v2426_v8 = vpop.f32.mrf.mxu1  ;;  %v2507_v49 = vpop.f32.mrf.mxu0 }
 0x3d5   : > { %v2508_v7 = vadd.f32 %v2507_v49, %v2403_v22  ;;  %v2427_v39 = vadd.f32 %v2426_v8, %v2323_v13 }
 0x3d6   : > { %v4490_v51 = vpop.f32.mrf.mxu1  ;;  %v4498_v53 = vpop.f32.mrf.mxu0 }
 0x3d8   : > { %v2434_v55 = vpop.f32.mrf.mxu1  ;;  %v2513_v58 = vpop.f32.mrf.mxu0 }
 0x3d9   : > { %v2514_v26 = vadd.f32 %v2513_v58, %v2411_v14  ;;  %v2435_v36 = vadd.f32 %v2434_v55, %v2330_v44 }
 0x3da   : > { %v4493_v63 = vpop.f32.mrf.mxu1  ;;  %v4501_v52 = vpop.f32.mrf.mxu0 }
 0x3dc   : > { %v2519_v5 = vpop.f32.mrf.mxu0  ;;  %v2602_v11 = vpop.f32.mrf.mxu1 }
 0x3dd   : > { %v2520_v34 = vadd.f32 %v2519_v5, %v2419_v31  ;;  %v2603_v10 = vadd.f32 %v2602_v11, %v2508_v7  ;;  %v2722_v5 = vand.u32 4294901760, %v2721_v59 }
 0x3de   : > { %v4504_v2 = vpop.f32.mrf.mxu0  ;;  %v4515_v40 = vpop.f32.mrf.mxu1 }
 0x3df   : > { %v5558_v46 = vsub.f32 %v5283_v33, %v2603_v10 }
 0x3e0   : > { %v2525_v27 = vpop.f32.mrf.mxu0  ;;  %v2608_v60 = vpop.f32.mrf.mxu1 }
 0x3e1   : > { %v2609_v18 = vadd.f32 %v2608_v60, %v2514_v26  ;;  %v2526_v19 = vadd.f32 %v2525_v27, %v2427_v39  ;;  %v5571_v45 = vand.u32 4294901760, %v5558_v46  ;;  %v3977_v60 = vld [vmem:[%s5869_s3 + $0x50] sm:$0xff] }
 0x3e2   : > { %v4507_v20 = vpop.f32.mrf.mxu0  ;;  %v4518_v23 = vpop.f32.mrf.mxu1  ;;  %v3174_v29 = vsel %vm831_vm2, %v3977_v60, 0 }
 0x3e3   : > { %v5552_v28 = vsub.f32 %v5277_v0, %v2609_v18  ;;  %v2775_v63 = vsub.f32 %v5558_v46, %v5571_v45  ;;  %v3978_v18 = vld [vmem:[%s5869_s3 + $0x58] sm:$0xff]  ;;  %v2644_v20 = vpop.permute.xlu0 %2643 }
 0x3e4   : > { %v2531_v25 = vpop.f32.mrf.mxu0  ;;  %v2614_v37 = vpop.f32.mrf.mxu1  ;;  %v3177_v13 = vsel %vm831_vm2, %v3978_v18, 0 }
 0x3e5   : > { %v2615_v30 = vadd.f32 %v2614_v37, %v2520_v34  ;;  %v5564_v48 = vand.u32 4294901760, %v5552_v28  ;;  %v2532_v33 = vadd.f32 %v2531_v25, %v2435_v36  ;;  %v2776_v14 = vand.u32 4294901760, %v2775_v63  ;;  %v3979_v34 = vld [vmem:[%s5869_s3 + $0x60] sm:$0xff] }
 0x3e6   : > { %v4521_v42 = vpop.f32.mrf.mxu1  ;;  %v4510_v43 = vpop.f32.mrf.mxu0  ;;  %v5661_v37 = vand.u32 4294901760, %v3177_v13  ;;  %v3180_v38 = vsel %vm831_vm2, %v3979_v34, 0 }
 0x3e7   : > { %v5561_v15 = vsub.f32 %v5286_v35, %v2615_v30  ;;  %v2768_v54 = vsub.f32 %v5552_v28, %v5564_v48  ;;  %v2777_v57 = vsub.f32 %v2775_v63, %v2776_v14  ;;  %v3980_v30 = vld [vmem:[%s5869_s3 + $0x68] sm:$0xff] }
 0x3e8   : > { %v2620_v47 = vpop.f32.mrf.mxu1 }
 0x3e9   : > { %v5567_v0 = vand.u32 4294901760, %v5561_v15  ;;  %v2621_v8 = vadd.f32 %v2620_v47, %v2526_v19  ;;  %v2769_v4 = vand.u32 4294901760, %v2768_v54  ;;  %v2778_v22 = vand.u32 4294901760, %v2777_v57 }
 0x3ea   : > { %v4524_v49 = vpop.f32.mrf.mxu1  ;;  %v5669_v19 = vsub.f32 %v3177_v13, %v5661_v37  ;;  %v5671_v47 = vand.u32 4294901760, %v3180_v38 }
 0x3eb   : > { %v2761_v35 = vsub.f32 %v5561_v15, %v5567_v0  ;;  %v5576_v51 = vsub.f32 %v5303_v41, %v2621_v8  ;;  %v2770_v2 = vsub.f32 %v2768_v54, %v2769_v4  ;;  %v3981_v8 = vld [vmem:[%s5869_s3 + $0x70] sm:$0x1] }
 0x3ec   : > { %v2626_v53 = vpop.f32.mrf.mxu1 }
 0x3ed   : > { %v5581_v55 = vand.u32 4294901760, %v5576_v51  ;;  %v2627_v58 = vadd.f32 %v2626_v53, %v2532_v33  ;;  %v2762_v56 = vand.u32 4294901760, %v2761_v35  ;;  %v2771_v21 = vand.u32 4294901760, %v2770_v2 }
 0x3ee   : > { %v4527_v62 = vpop.f32.mrf.mxu1  ;;  %v3186_v53 = vsel %vm831_vm2, %v3981_v8, 0 }
 0x3ef   : > { %v2754_v41 = vsub.f32 %v5576_v51, %v5581_v55  ;;  %v2634_v52 = vadd.f32 127.5, %v2627_v58  ;;  %4529 = vmatpush3.msra.mxu0 %v5581_v55  ;;  %v2763_v16 = vsub.f32 %v2761_v35, %v2762_v56 }
 0x3f0   : > { %4530 = vmatprep.subr.mxu0 %v4845_v1 }
 0x3f1   : > { %v4698_v61 = vtrunc.f32 %v2634_v52  ;;  %4531 = vmatpush3.msra.mxu0 %v5567_v0  ;;  %v2755_v3 = vand.u32 4294901760, %v2754_v41  ;;  %v2764_v40 = vand.u32 4294901760, %v2763_v16  ;;  %v5694_v52 = vand.u32 4294901760, %v3186_v53 }
 0x3f2   : > { %4532 = vmatprep.subr.mxu0 %v4845_v1 }
 0x3f3   : > { %v4699_v11 = vcvt.f32.s32 %v4698_v61  ;;  %4533 = vmatpush3.msra.mxu0 %v5564_v48  ;;  %v2756_v12 = vsub.f32 %v2754_v41, %v2755_v3 }
 0x3f4   : > { %4534 = vmatprep.subr.mxu0 %v4845_v1 }
 0x3f5   : > { %2636 = vst [vmem:[%s5334_s15 + $0x1] sm:$0x1] %v4699_v11  ;;  %4535 = vmatpush3.msra.mxu0 %v5571_v45  ;;  %v2757_v17 = vand.u32 4294901760, %v2756_v12  ;;  %v3294_v12 = vsub.f32 %v3186_v53, %v5694_v52 }
 0x3f6   : > { %4537 = vmatmul.mubr.f32.vlgmr.msra.gmra.mxu0 %v2722_v5  ;;  %4550 = vmatprep.subr.mxu0 %v4845_v1 }
 0x3f7   : > { %4540 = vmatpush3.msra.mxu1 %v2757_v17  ;;  %4551 = vmatpush3.msra.mxu0 %v2754_v41 }
 0x3f8   : > { %4541 = vmatprep.subr.mxu1 %v4845_v1  ;;  %4552 = vmatprep.subr.mxu0 %v4845_v1 }
 0x3f9   : > { %4542 = vmatpush3.msra.mxu1 %v2764_v40  ;;  %4553 = vmatpush3.msra.mxu0 %v2761_v35  ;;  %v3295_v40 = vand.u32 4294901760, %v3294_v12 }
 0x3fa   : > { %4543 = vmatprep.subr.mxu1 %v4845_v1  ;;  %4554 = vmatprep.subr.mxu0 %v4845_v1 }
 0x3fb   : > { %4544 = vmatpush3.msra.mxu1 %v2771_v21  ;;  %4555 = vmatpush3.msra.mxu0 %v2768_v54 }
 0x3fc   : > { %4545 = vmatprep.subr.mxu1 %v4845_v1  ;;  %4556 = vmatprep.subr.mxu0 %v4845_v1 }
 0x3fd   : > { %4546 = vmatpush3.msra.mxu1 %v2778_v22  ;;  %4557 = vmatpush3.msra.mxu0 %v2775_v63  ;;  %v3296_v22 = vsub.f32 %v3294_v12, %v3295_v40 }
 0x3fe   : > { %4548 = vmatmul.mubr.f32.vlgmr.msra.gmra.mxu1 %v5548_v32  ;;  %4558 = vmatprep.mubr.msk.f32.mxu0 %vm4846_vm1, %v4845_v1 }
 0x3ff   : > { %4561 = vmatprep.subr.mxu1 %v4845_v1  ;;  %4572 = vmatprep.subr.mxu0 %v4845_v1 }
 0x400   : > { %4559 = vmatmul.mubr.f32.vlgmr.msra.gmra.mxu0 %v5555_v9  ;;  %4562 = vmatpush3.msra.mxu1 %v5581_v55 }
 0x401   : > { %4573 = vmatpush3.msra.mxu0 %v2755_v3  ;;  %4563 = vmatprep.subr.mxu1 %v4845_v1 }
 0x402   : > { %4574 = vmatprep.subr.mxu0 %v4845_v1  ;;  %4564 = vmatpush3.msra.mxu1 %v5567_v0 }
 0x403   : > { %4575 = vmatpush3.msra.mxu0 %v2762_v56  ;;  %4565 = vmatprep.subr.mxu1 %v4845_v1  ;;  %v4850_v56 = vmov -0.25  }
 0x404   : > { %4576 = vmatprep.subr.mxu0 %v4845_v1  ;;  %4566 = vmatpush3.msra.mxu1 %v5564_v48 }
 0x405   : > { %4577 = vmatpush3.msra.mxu0 %v2769_v4  ;;  %4567 = vmatprep.subr.mxu1 %v4845_v1 }
 0x406   : > { %4578 = vmatprep.subr.mxu0 %v4845_v1  ;;  %4568 = vmatpush3.msra.mxu1 %v5571_v45 }
 0x407   : > { %4569 = vmatprep.mubr.msk.f32.mxu1 %vm4846_vm1, %v4845_v1  ;;  %4579 = vmatpush3.msra.mxu0 %v2776_v14 }
 0x408   : > { %4570 = vmatmul.mubr.f32.vlgmr.msra.gmra.mxu1 %v2720_v50  ;;  %4583 = vmatprep.subr.mxu1 %v4845_v1  ;;  %v3265_v50 = vand.u32 4294901760, %v5669_v19 }
 0x409   : > { %4580 = vmatprep.mubr.msk.f32.mxu0 %vm4846_vm1, %v4845_v1  ;;  %4584 = vmatpush3.msra.mxu1 %v5581_v55 }
 0x40a   : > { %4581 = vmatmul.mubr.f32.vlgmr.msra.gmra.mxu0 %v5548_v32  ;;  %4585 = vmatprep.subr.mxu1 %v4845_v1  ;;  %v3266_v62 = vsub.f32 %v5669_v19, %v3265_v50 }
 0x40b   : > { %4586 = vmatpush3.msra.mxu1 %v5567_v0  ;;  %4591 = vmatprep.mubr.msk.f32.mxu1 %vm4846_vm1, %v4845_v1 }
 0x40c   : > { %4587 = vmatprep.subr.mxu1 %v4845_v1  ;;  %4594 = vmatprep.subr.mxu0 %v4845_v1  ;;  %v3267_v4 = vand.u32 4294901760, %v3266_v62 }
 0x40d   : > { %4588 = vmatpush3.msra.mxu1 %v5564_v48  ;;  %4596 = vmatprep.mubr.msk.f32.mxu0 %vm4846_vm1, %v4845_v1  ;;  %v3183_v48 = vsel %vm831_vm2, %v3980_v30, 0 }
 0x40e   : > { %4589 = vmatprep.subr.mxu1 %v4845_v1  ;;  %v5684_v33 = vand.u32 4294901760, %v3183_v48 }
 0x40f   : > { %4590 = vmatpush3.msra.mxu1 %v5571_v45  ;;  %v5682_v45 = vsub.f32 %v3180_v38, %v5671_v47 }
 0x410   : > { %4592 = vmatmul.mubr.f32.vlgmr.msra.gmra.mxu1 %v5548_v32  ;;  %4611 = vmatprep.subr.mxu1 %v4845_v1  ;;  %v5652_v32 = vand.u32 4294901760, %v3174_v29  ;;  %v5692_v41 = vsub.f32 %v3183_v48, %v5684_v33 }
 0x411   : > { %4613 = vmatprep.mubr.msk.f32.mxu1 %vm4846_vm1, %v4845_v1  ;;  %v3275_v63 = vand.u32 4294901760, %v5682_v45 }
 0x412   : > { %v5659_v25 = vsub.f32 %v3174_v29, %v5652_v32  ;;  %v3285_v11 = vand.u32 4294901760, %v5692_v41 }
 0x413   : > { %v3276_v5 = vsub.f32 %v5682_v45, %v3275_v63 }
 0x414   : > { %v3255_v42 = vand.u32 4294901760, %v5659_v25  ;;  %v3286_v2 = vsub.f32 %v5692_v41, %v3285_v11 }
 0x415   : > { %v3277_v17 = vand.u32 4294901760, %v3276_v5 }
 0x416   : > { %v3256_v49 = vsub.f32 %v5659_v25, %v3255_v42  ;;  %v3287_v21 = vand.u32 4294901760, %v3286_v2 }
 0x418   : > { %v3257_v58 = vand.u32 4294901760, %v3256_v49 }
 0x4b6   : > { %v2724_v26 = vpop.f32.mrf.mxu0 }
 0x4b7   : > { %v2725_v24 = vadd.f32 %v2724_v26, %v2644_v20  ;;  %v3297_v26 = vand.u32 4294901760, %v3296_v22 }
 0x4b8   : > { %v4538_v27 = vpop.f32.mrf.mxu0 }
 0x4be   : > { %v2815_v6 = vpop.f32.mrf.mxu1 }
 0x4bf   : > { %v2816_v10 = vadd.f32 %v2815_v6, %v2725_v24 }
 0x4c0   : > { %v2895_v31 = vpop.f32.mrf.mxu0  ;;  %v4549_v7 = vpop.f32.mrf.mxu1 }
 0x4c1   : > { %v2896_v9 = vadd.f32 %v2895_v31, %v2816_v10 }
 0x4c2   : > { %v4560_v23 = vpop.f32.mrf.mxu0 }
 0x4c8   : > { %v2972_v39 = vpop.f32.mrf.mxu1 }
 0x4c9   : > { %v2973_v36 = vadd.f32 %v2972_v39, %v2896_v9 }
 0x4ca   : > { %v3055_v43 = vpop.f32.mrf.mxu0  ;;  %v4571_v44 = vpop.f32.mrf.mxu1 }
 0x4cb   : > { %v3056_v35 = vadd.f32 %v3055_v43, %v2973_v36 }
 0x4cc   : > { %v4582_v0 = vpop.f32.mrf.mxu0 }
 0x4cd   : > { %v3171_v0 = vpop.permute.xlu0 %3170 }
 0x4d0   : > { %v3130_v54 = vpop.f32.mrf.mxu1 }
 0x4d1   : > { %v3131_v55 = vadd.f32 %v3130_v54, %v3056_v35  ;;  %v3151_v53 = vpop.permute.xlu0 %3150 }
 0x4d2   : > { %v4593_v59 = vpop.f32.mrf.mxu1 }
 0x4d3   : > { %vm3134_vm5 = vcmp.gt.f32.partialorder %v3131_v55, 0.0 }
 0x4d4   : > { %v3135_v61 = vsel %vm3134_vm5, 0.25, %v4850_v56 }
 0x4d5   : > { %v3334_v3 = vsub.f32 %v3135_v61, %v3135_v61  ;;  %4595 = vmatpush3.msra.mxu0 %v3135_v61 }
 0x4d6   : > { %4597 = vmatmul.mubr.f32.vlgmr.msra.gmra.mxu0 %v3257_v58  ;;  %4628 = vmatprep.subr.mxu0 %v4845_v1 }
 0x4d7   : > { %4629 = vmatpush3.msra.mxu0 %v3334_v3  ;;  %4599 = vmatprep.mubr.msk.f32.mxu0 %vm4846_vm1, %v4845_v1  ;;  %v3335_v16 = vand.u32 4294901760, %v3334_v3 }
 0x4d8   : > { %4662 = vmatprep.subr.mxu0 %v4845_v1 }
 0x4d9   : > { %v3336_v14 = vsub.f32 %v3334_v3, %v3335_v16 }
 0x4da   : > { %4600 = vmatmul.mubr.f32.gmra.mxu0 %v3267_v4 }
 0x4db   : > { %4602 = vmatprep.mubr.msk.f32.mxu0 %vm4846_vm1, %v4845_v1  ;;  %v3337_v57 = vand.u32 4294901760, %v3336_v14 }
 0x4dd   : > { %4612 = vmatpush3.msra.mxu1 %v3337_v57 }
 0x4de   : > { %4603 = vmatmul.mubr.f32.gmra.mxu0 %v3277_v17  ;;  %4614 = vmatmul.mubr.f32.vlgmr.msra.gmra.mxu1 %v5652_v32 }
 0x4df   : > { %4645 = vmatprep.subr.mxu1 %v4845_v1  ;;  %4605 = vmatprep.mubr.msk.f32.mxu0 %vm4846_vm1, %v4845_v1 }
 0x4e0   : > { %4646 = vmatpush3.msra.mxu1 %v3135_v61  ;;  %4616 = vmatprep.mubr.msk.f32.mxu1 %vm4846_vm1, %v4845_v1 }
 0x4e1   : > { %4679 = vmatprep.subr.mxu1 %v4845_v1 }
 0x4e2   : > { %4606 = vmatmul.mubr.f32.gmra.mxu0 %v3287_v21  ;;  %4617 = vmatmul.mubr.f32.gmra.mxu1 %v5661_v37 }
 0x4e3   : > { %4608 = vmatprep.mubr.msk.f32.mxu0 %vm4846_vm1, %v4845_v1  ;;  %4619 = vmatprep.mubr.msk.f32.mxu1 %vm4846_vm1, %v4845_v1 }
 0x4e6   : > { %4609 = vmatmul.mubr.f32.gmra.mxu0 %v3297_v26  ;;  %4620 = vmatmul.mubr.f32.gmra.mxu1 %v5671_v47 }
 0x4e7   : > { %4622 = vmatprep.mubr.msk.f32.mxu1 %vm4846_vm1, %v4845_v1  ;;  %4630 = vmatprep.mubr.msk.f32.mxu0 %vm4846_vm1, %v4845_v1 }
 0x4ea   : > { %4623 = vmatmul.mubr.f32.gmra.mxu1 %v5684_v33  ;;  %4631 = vmatmul.mubr.f32.vlgmr.msra.gmra.mxu0 %v5659_v25 }
 0x4eb   : > { %4663 = vmatpush3.msra.mxu0 %v3335_v16  ;;  %4625 = vmatprep.mubr.msk.f32.mxu1 %vm4846_vm1, %v4845_v1 }
 0x4ec   : > { %4633 = vmatprep.mubr.msk.f32.mxu0 %vm4846_vm1, %v4845_v1 }
 0x4ee   : > { %4626 = vmatmul.mubr.f32.gmra.mxu1 %v5694_v52  ;;  %4634 = vmatmul.mubr.f32.gmra.mxu0 %v5669_v19 }
 0x4ef   : > { %4636 = vmatprep.mubr.msk.f32.mxu0 %vm4846_vm1, %v4845_v1  ;;  %4647 = vmatprep.mubr.msk.f32.mxu1 %vm4846_vm1, %v4845_v1 }
 0x4f2   : > { %4637 = vmatmul.mubr.f32.gmra.mxu0 %v5682_v45  ;;  %4648 = vmatmul.mubr.f32.vlgmr.msra.gmra.mxu1 %v3255_v42 }
 0x4f3   : > { %4680 = vmatpush3.msra.mxu1 %v3135_v61  ;;  %4639 = vmatprep.mubr.msk.f32.mxu0 %vm4846_vm1, %v4845_v1 }
 0x4f4   : > { %4650 = vmatprep.mubr.msk.f32.mxu1 %vm4846_vm1, %v4845_v1 }
 0x4f6   : > { %4640 = vmatmul.mubr.f32.gmra.mxu0 %v5692_v41  ;;  %4651 = vmatmul.mubr.f32.gmra.mxu1 %v3265_v50 }
 0x4f7   : > { %4642 = vmatprep.mubr.msk.f32.mxu0 %vm4846_vm1, %v4845_v1  ;;  %4653 = vmatprep.mubr.msk.f32.mxu1 %vm4846_vm1, %v4845_v1 }
 0x4fa   : > { %4643 = vmatmul.mubr.f32.gmra.mxu0 %v3294_v12  ;;  %4654 = vmatmul.mubr.f32.gmra.mxu1 %v3275_v63  ;;  %v3156_v63 = vpop.permute.xlu1 %3155 }
 0x4fb   : > { %4656 = vmatprep.mubr.msk.f32.mxu1 %vm4846_vm1, %v4845_v1  ;;  %4664 = vmatprep.mubr.msk.f32.mxu0 %vm4846_vm1, %v4845_v1 }
 0x4fe   : > { %4657 = vmatmul.mubr.f32.gmra.mxu1 %v3285_v11  ;;  %4665 = vmatmul.mubr.f32.vlgmr.msra.gmra.mxu0 %v5652_v32  ;;  %v3161_v11 = vpop.permute.xlu0 %3160  ;;  %v3166_v26 = vpop.permute.xlu1 %3165 }
 0x4ff   : > { %4659 = vmatprep.mubr.msk.f32.mxu1 %vm4846_vm1, %v4845_v1  ;;  %4667 = vmatprep.mubr.msk.f32.mxu0 %vm4846_vm1, %v4845_v1 }
 0x502   : > { %4660 = vmatmul.mubr.f32.gmra.mxu1 %v3295_v40  ;;  %4668 = vmatmul.mubr.f32.gmra.mxu0 %v5661_v37 }
 0x503   : > { %4670 = vmatprep.mubr.msk.f32.mxu0 %vm4846_vm1, %v4845_v1  ;;  %4681 = vmatprep.mubr.msk.f32.mxu1 %vm4846_vm1, %v4845_v1 }
 0x506   : > { %4671 = vmatmul.mubr.f32.gmra.mxu0 %v5671_v47  ;;  %4682 = vmatmul.mubr.f32.vlgmr.msra.gmra.mxu1 %v5652_v32 }
 0x507   : > { %4673 = vmatprep.mubr.msk.f32.mxu0 %vm4846_vm1, %v4845_v1  ;;  %4684 = vmatprep.mubr.msk.f32.mxu1 %vm4846_vm1, %v4845_v1 }
 0x50a   : > { %4674 = vmatmul.mubr.f32.gmra.mxu0 %v5684_v33  ;;  %4685 = vmatmul.mubr.f32.gmra.mxu1 %v5661_v37 }
 0x50b   : > { %4676 = vmatprep.mubr.msk.f32.mxu0 %vm4846_vm1, %v4845_v1  ;;  %4687 = vmatprep.mubr.msk.f32.mxu1 %vm4846_vm1, %v4845_v1 }
 0x50e   : > { %4677 = vmatmul.mubr.f32.gmra.mxu0 %v5694_v52  ;;  %4688 = vmatmul.mubr.f32.gmra.mxu1 %v5671_v47 }
 0x50f   : > { %4690 = vmatprep.mubr.msk.f32.mxu1 %vm4846_vm1, %v4845_v1 }
 0x512   : > { %4691 = vmatmul.mubr.f32.gmra.mxu1 %v5684_v33 }
 0x513   : > { %4693 = vmatprep.mubr.msk.f32.mxu1 %vm4846_vm1, %v4845_v1 }
 0x516   : > { %4694 = vmatmul.mubr.f32.gmra.mxu1 %v5694_v52 }
 0x596   : > { %v3259_v27 = vpop.f32.mrf.mxu0 }
 0x597   : > { %v3260_v58 = vadd.f32 %v3259_v27, %v3151_v53 }
 0x598   : > { %v4598_v60 = vpop.f32.mrf.mxu0 }
 0x59a   : > { %v3269_v6 = vpop.f32.mrf.mxu0 }
 0x59b   : > { %v3270_v61 = vadd.f32 %v3269_v6, %v3156_v63 }
 0x59c   : > { %v4601_v29 = vpop.f32.mrf.mxu0 }
 0x59d   : > { %v3808_v29 = vld [vmem:[%s4970_s19] sm:$0xff] }
 0x59e   : > { %v3279_v31 = vpop.f32.mrf.mxu0  ;;  %v3374_v7 = vpop.f32.mrf.mxu1 }
 0x59f   : > { %v3375_v41 = vadd.f32 %v3374_v7, %v3260_v58  ;;  %v3280_v2 = vadd.f32 %v3279_v31, %v3161_v11  ;;  %v3811_v58 = vld [vmem:[%s4970_s19 + $0x18] sm:$0xff] }
 0x5a0   : > { %v4604_v18 = vpop.f32.mrf.mxu0  ;;  %v4615_v32 = vpop.f32.mrf.mxu1 }
 0x5a2   : > { %v3289_v20 = vpop.f32.mrf.mxu0  ;;  %v3380_v23 = vpop.f32.mrf.mxu1 }
 0x5a3   : > { %v3381_v12 = vadd.f32 %v3380_v23, %v3270_v61  ;;  %v3290_v32 = vadd.f32 %v3289_v20, %v3166_v26 }
 0x5a4   : > { %v4607_v24 = vpop.f32.mrf.mxu0  ;;  %v4618_v13 = vpop.f32.mrf.mxu1 }
 0x5a6   : > { %v5783_v34 = vpop.f32.mrf.mxu0  ;;  %v3386_v10 = vpop.f32.mrf.mxu1 }
 0x5a7   : > { %v3387_v27 = vadd.f32 %v3386_v10, %v3280_v2  ;;  %v3809_v10 = vld [vmem:[%s4970_s19 + $0x8] sm:$0xff] }
 0x5a8   : > { %v4610_v25 = vpop.f32.mrf.mxu0  ;;  %v4621_v37 = vpop.f32.mrf.mxu1 }
 0x5aa   : > { %v3392_v1 = vpop.f32.mrf.mxu1  ;;  %v3471_v38 = vpop.f32.mrf.mxu0 }
 0x5ab   : > { %v3472_v3 = vadd.f32 %v3471_v38, %v3375_v41  ;;  %v3393_v37 = vadd.f32 %v3392_v1, %v3290_v32 }
 0x5ac   : > { %v4624_v39 = vpop.f32.mrf.mxu1  ;;  %v4632_v30 = vpop.f32.mrf.mxu0 }
 0x5ae   : > { %v5785_v9 = vpop.f32.mrf.mxu1  ;;  %v3478_v42 = vpop.f32.mrf.mxu0 }
 0x5af   : > { %v3479_v40 = vadd.f32 %v3478_v42, %v3381_v12 }
 0x5b0   : > { %v4627_v43 = vpop.f32.mrf.mxu1  ;;  %v4635_v44 = vpop.f32.mrf.mxu0 }
 0x5b1   : > { %v3300_v44 = vadd.f32 %v5783_v34, %v3171_v0  ;;  %v3810_v34 = vld [vmem:[%s4970_s19 + $0x10] sm:$0xff]  ;;  %s4767_s19 = scalar_lea.vmem %s5810_s28, 512 }
 0x5b2   : > { %v3485_v19 = vpop.f32.mrf.mxu0  ;;  %v3572_v47 = vpop.f32.mrf.mxu1  ;;  %p4768_p12 = scmp.ne.s32.totalorder %s5810_s28, %s4767_s19  ;;  %p4775_p2 = scmp.lt.s32.totalorder %s4773_s16, %s4767_s19 }
 0x5b3   : > { %v3573_v16 = vadd.f32 %v3572_v47, %v3472_v3  ;;  %v3486_v23 = vadd.f32 %v3485_v19, %v3387_v27  ;;  %v3399_v19 = vadd.f32 %v5785_v9, %v3300_v44 }
 0x5b4   : > { %v4638_v36 = vpop.f32.mrf.mxu0  ;;  %v4649_v48 = vpop.f32.mrf.mxu1  ;;  %p4769_p13 = pnand %p4768_p12, %p4929_p4  ;;  %p4776_p3 = por %p4775_p2, %p4774_p1 }
 0x5b6   : > { %v3492_v8 = vpop.f32.mrf.mxu0  ;;  %v3580_v49 = vpop.f32.mrf.mxu1  ;;  %p4770_p0 = pneg %p4769_p13 }
 0x5b7   : > { %v3581_v60 = vadd.f32 %v3580_v49, %v3479_v40  ;;  %v3493_v47 = vadd.f32 %v3492_v8, %v3393_v37 }
 0x5b8   : > { %v4641_v50 = vpop.f32.mrf.mxu0  ;;  %v4652_v45 = vpop.f32.mrf.mxu1  ;;  %p4777_p5 = pnand %p4776_p3, %p4770_p0 }
 0x5ba   : > { %v5787_v33 = vpop.f32.mrf.mxu0  ;;  %v3588_v35 = vpop.f32.mrf.mxu1 }
 0x5bb   : > { %v3589_v38 = vadd.f32 %v3588_v35, %v3486_v23  ;;  %v3500_v45 = vadd.f32 %v5787_v33, %v3399_v19 }
 0x5bc   : > { %v4644_v54 = vpop.f32.mrf.mxu0  ;;  %v4655_v55 = vpop.f32.mrf.mxu1 }
 0x5be   : > { %v3596_v59 = vpop.f32.mrf.mxu1  ;;  %v3677_v62 = vpop.f32.mrf.mxu0 }
 0x5bf   : > { %v3678_v57 = vadd.f32 %v3677_v62, %v3573_v16  ;;  %v3597_v48 = vadd.f32 %v3596_v59, %v3493_v47 }
 0x5c0   : > { %v4658_v52 = vpop.f32.mrf.mxu1  ;;  %v4666_v56 = vpop.f32.mrf.mxu0 }
 0x5c2   : > { %v3604_v4 = vpop.f32.mrf.mxu1  ;;  %v3683_v5 = vpop.f32.mrf.mxu0 }
 0x5c3   : > { %v3684_v24 = vadd.f32 %v3683_v5, %v3581_v60  ;;  %v3605_v54 = vadd.f32 %v3604_v4, %v3500_v45 }
 0x5c4   : > { %v4661_v14 = vpop.f32.mrf.mxu1  ;;  %v4669_v17 = vpop.f32.mrf.mxu0 }
 0x5c6   : > { %v3689_v21 = vpop.f32.mrf.mxu0  ;;  %v3772_v22 = vpop.f32.mrf.mxu1 }
 0x5c7   : > { %v3773_v6 = vadd.f32 %v3772_v22, %v3678_v57  ;;  %v3690_v36 = vadd.f32 %v3689_v21, %v3589_v38 }
 0x5c8   : > { %v4672_v7 = vpop.f32.mrf.mxu0  ;;  %v4683_v18 = vpop.f32.mrf.mxu1 }
 0x5c9   : > { %v3800_v13 = vsub.f32 %v5558_v46, %v3773_v6 }
 0x5ca   : > { %v3695_v31 = vpop.f32.mrf.mxu0  ;;  %v3778_v25 = vpop.f32.mrf.mxu1 }
 0x5cb   : > { %v3812_v39 = vsub.f32 %v3808_v29, %v3800_v13  ;;  %v3779_v30 = vadd.f32 %v3778_v25, %v3684_v24  ;;  %v3696_v35 = vadd.f32 %v3695_v31, %v3597_v48 }
 0x5cc   : > { %v4675_v42 = vpop.f32.mrf.mxu0  ;;  %v4686_v43 = vpop.f32.mrf.mxu1 }
 0x5cd   : > { %3816 = vst [vmem:[%s5796_s27] sm:$0xff] %v3812_v39  ;;  %v3801_v46 = vsub.f32 %v5552_v28, %v3779_v30 }
 0x5ce   : > { %v3701_v20 = vpop.f32.mrf.mxu0  ;;  %v3784_v1 = vpop.f32.mrf.mxu1 }
 0x5cf   : > { %v3813_v49 = vsub.f32 %v3809_v10, %v3801_v46  ;;  %v3785_v50 = vadd.f32 %v3784_v1, %v3690_v36  ;;  %v3702_v62 = vadd.f32 %v3701_v20, %v3605_v54 }
 0x5d0   : > { %v4689_v0 = vpop.f32.mrf.mxu1  ;;  %v4678_v8 = vpop.f32.mrf.mxu0 }
 0x5d1   : > { %3817 = vst [vmem:[%s5796_s27 + $0x8] sm:$0xff] %v3813_v49  ;;  %v3802_v28 = vsub.f32 %v5561_v15, %v3785_v50 }
 0x5d2   : > { %v3790_v53 = vpop.f32.mrf.mxu1 }
 0x5d3   : > { %v3814_v9 = vsub.f32 %v3810_v34, %v3802_v28  ;;  %v3791_v55 = vadd.f32 %v3790_v53, %v3696_v35 }
 0x5d4   : > { %v4692_v59 = vpop.f32.mrf.mxu1 }
 0x5d5   : > { %3818 = vst [vmem:[%s5796_s27 + $0x10] sm:$0xff] %v3814_v9  ;;  %v3803_v63 = vsub.f32 %v5576_v51, %v3791_v55 }
 0x5d6   : > { %v3796_v15 = vpop.f32.mrf.mxu1 }
 0x5d7   : > { %v3815_v33 = vsub.f32 %v3811_v58, %v3803_v63  ;;  %v3797_v41 = vadd.f32 %v3796_v15, %v3702_v62 }
 0x5d8   : > { %v4695_v52 = vpop.f32.mrf.mxu1 }
 0x5d9   : > { %3819 = vst [vmem:[%s5796_s27 + $0x18] sm:$0xff] %v3815_v33  ;;  %v3804_v56 = vmul.f32 2.0, %v3797_v41 }
 0x5da   : > { %4780 = shalt.err (!%p4777_p5)
}
 0x5db   : > { %s4781_s17 = scalar_lea.hbm %s5815_s12, 512  ;;  %s4785_s27 = scalar_lea.hbm %s5871_s5, 1024 }
 0x5dc   : > { %p4782_p6 = scmp.ne.s32.totalorder %s5815_s12, %s4781_s17  ;;  %p4786_p10 = scmp.lt.s32.totalorder %s5815_s12, %s5871_s5 }
 0x5dd   : > { %p4787_p11 = scmp.lt.s32.totalorder %s4785_s27, %s4781_s17 }
 0x5de   : > { %p4783_p7 = pnand %p4782_p6, %p4929_p4 }
 0x5df   : > { %p4788_p12 = por %p4787_p11, %p4786_p10 }
 0x5e0   : > { %p4784_p9 = pneg %p4783_p7 }
 0x5e2   : > { %p4789_p13 = pnand %p4788_p12, %p4784_p9 }
 0x5e4   : > { %4792 = shalt.err (!%p4789_p13)
}
 0x5e5   : > { %s4852_s11 = smov 128   ;;  %s4853_s19 = smov 8   ;;  %v3805_v51 = vadd.f32 127.5, %v3804_v56 }
 0x5e6   : > { %4702 = dma.vmem_to_hbm [thread:$0]  (%p4929_p4), %s5810_s28, 512, %s5815_s12, %s5820_s24, %s4852_s11, %s4852_s11, %s4853_s19  }
 0x5e7   : > { %v4700_v61 = vtrunc.f32 %v3805_v51 }
 0x5e9   : > { %v4701_v3 = vcvt.f32.s32 %v4700_v61 }
 0x5eb   : > { %3807 = vst [vmem:[%s5334_s15 + $0x2] sm:$0x1] %v4701_v3 }
 0x5ec PF: > { %p4708_p0 = scmp.ge.s32.totalorder %s4843_s26, 2  ;;  %s3860_s13 = sand.u32 1, %s4823_s21  }
 0x5ed   : > { %s3861_s14 = scalar_lea.sflag [#allocation3], %s3860_s13 }
 0x5ee   : > { %p4705_p1 = pnand %p4708_p0, %p4936_p8 }
 0x5f0   : > { %p4706_p2 = pneg %p4705_p1 }
 0x5f2   : > { %4818 = dma.done.wait (%p4706_p2), %s3861_s14, 512  }
 0x5f3   : > { %4820 = vsyncadd (%p4706_p2), %s3861_s14, 4294966784  ;;  %s20_s26 = sadd.s32 1, %s4843_s26   ;;  %s5875_s21 = smov %s4827_s22 }
 0x5f4   : > { %p17_p3 = scmp.ge.s32.totalorder %s20_s26, 4   ;;  %s5876_s22 = smov %s4831_s23 }
 0x5f5   : > { %s5877_s23 = smov %s4942_s10  ;;  %s5878_s24 = smov %s4839_s25 }
 0x5f6   : > { %s5879_s25 = smov %s5881_s29  ;;  %19 = sbr.rel (!%p17_p3) target bundleno = 4 (0x4), region = 95 }
 0x5fb   :  { %3876 = vsyncpa [#allocation3], 1 }
 0x5fc   :  { %3878 = vsyncpa [#allocation3 + $0x1], 1 }

</bundles_post_ra>
